<compile_context>
chip_gen: v5e
topology: v5e:2x2
jax: 0.10.0
libtpu: 0.0.40
codegen_flags: <defaults>
</compile_context>

<pallas_src>
import jax
import jax.numpy as jnp
from jax.experimental import pallas as pl
from jax.experimental.pallas import tpu as pltpu


# --------------------------------------------------------------------------- #
# Kernel
# --------------------------------------------------------------------------- #
def softmax0_permute_kernel(x_ref, o_ref):
    # x_ref: (B, td1, td2) block of x1 in its natural layout (full B per block).
    # o_ref: (B, td2, td1) block of the permuted output.
    x = x_ref[...].astype(jnp.float32)              # f32 compute (bf16-safe, v5e-safe)
    m = jnp.max(x, axis=0, keepdims=True)           # softmax over the batch axis
    e = jnp.exp(x - m)                               # EUP
    s = jnp.sum(e, axis=0, keepdims=True)
    inv = 1.0 / s                                    # td1*td2 exact divides (keeps 1e-5)
    sm = e * inv                                     # broadcast multiply (VPU)
    # relu6 == clamp(x, 0, 6) is a mathematical no-op on softmax output -> dropped.
    y = sm.astype(o_ref.dtype)                       # cast BEFORE the transpose
    # Fused permute(0, 2, 1): swap the two minor dims on the VMEM tile (XLU slot).
    o_ref[...] = jnp.swapaxes(y, 1, 2)


# --------------------------------------------------------------------------- #
# VMEM-aware tile selection
# --------------------------------------------------------------------------- #
def _vmem_capacity_bytes() -> int:
    """Per-core VMEM capacity; conservative fallback = v7x's 64 MiB per TC."""
    try:
        return int(pltpu.get_tpu_info().vmem_capacity_bytes)
    except Exception:
        return 64 << 20


def _block_vmem_need(B, td1, td2, in_isz, out_isz) -> int:
    """Bytes needed for one grid step: double-buffered in/out DMA buffers plus
    ~3 full-tile f32 kernel-body temporaries (e, sm/y, transposed copy)."""
    elems = B * td1 * td2
    bufs = 2 * elems * in_isz + 2 * elems * out_isz
    temps = 3 * elems * 4
    return bufs + temps


def _divisor_tiles(dim: int, align: int):
    """Legal block extents for `dim`: the full dim plus multiples of `align`
    that divide it, descending."""
    out = [dim]
    t = (dim // align) * align
    while t >= align:
        if dim % t == 0 and t != dim:
            out.append(t)
        t -= align
    return out


def _choose_td2_1d(B, D1, D2, in_isz, out_isz, budget):
    """Tile only D2 (td1 = full D1).  Prefer, in order:
       (a) >= 2 tiles (v7x megacore) AND >= ~2 KiB contiguous input pieces,
       (b) >= 2 tiles,
       (c) the largest tile that fits the VMEM budget."""
    dma_min = max(128, 2048 // in_isz)
    fitting = [t for t in _divisor_tiles(D2, 128)
               if _block_vmem_need(B, D1, t, in_isz, out_isz) <= budget]
    if not fitting:
        return None
    split_big = [t for t in fitting if D2 // t >= 2 and t >= dma_min]
    split_any = [t for t in fitting if D2 // t >= 2]
    for group in (split_big, split_any, fitting):
        if group:
            return max(group)
    return None


def _choose_2d(B, D1, D2, in_isz, out_isz, budget):
    """Fallback: tile both minor dims; pick the largest legal block that fits."""
    best = None
    for t1 in _divisor_tiles(D1, 128):
        for t2 in _divisor_tiles(D2, 128):
            if _block_vmem_need(B, t1, t2, in_isz, out_isz) <= budget:
                area = t1 * t2
                if best is None or area > best[0]:
                    best = (area, t1, t2)
    return None if best is None else (best[1], best[2])


# --------------------------------------------------------------------------- #
# Forward pass
# --------------------------------------------------------------------------- #
def model_forward(x1):
    """Forward pass of the PyTorch Model. x1: (B, D1, D2). Returns (B*D2, D1)."""
    B, D1, D2 = x1.shape
    out_dtype = x1.dtype
    in_isz = x1.dtype.itemsize
    out_isz = jnp.dtype(out_dtype).itemsize

    cap = _vmem_capacity_bytes()
    budget = int(0.75 * cap)                 # headroom for compiler scratch

    # 1) Preferred: full D1 per block (contiguous transposed writeback), tile D2.
    td1, td2 = D1, _choose_td2_1d(B, D1, D2, in_isz, out_isz, budget)
    if td2 is None:
        # 2) Fall back to tiling both minor dims.
        picked = _choose_2d(B, D1, D2, in_isz, out_isz, budget)
        if picked is not None:
            td1, td2 = picked
        else:
            # 3) Irreducible: full-array block (softmax needs all of B anyway).
            td1, td2 = D1, D2

    grid = (D1 // td1, D2 // td2)

    need = _block_vmem_need(B, td1, td2, in_isz, out_isz)
    vmem_limit = int(min(max(int(1.5 * need), 4 << 20), cap))   # never below `need`

    total = B * D1 * D2
    cost = pl.CostEstimate(
        flops=5 * total,                           # max/sub/mul/sum (+ transpose moves)
        transcendentals=total,                     # one exp per element
        bytes_accessed=total * (in_isz + out_isz),  # one read + one write pass
    )

    v2_perm = pl.pallas_call(
        softmax0_permute_kernel,
        out_shape=jax.ShapeDtypeStruct((B, D2, D1), out_dtype),
        grid=grid,
        in_specs=[pl.BlockSpec((B, td1, td2), lambda i, j: (0, i, j))],
        out_specs=pl.BlockSpec((B, td2, td1), lambda i, j: (0, j, i)),
        compiler_params=pltpu.CompilerParams(
            dimension_semantics=("parallel", "parallel"),
            vmem_limit_bytes=vmem_limit,
        ),
        cost_estimate=cost,
    )(x1)

    # Flatten(0, 1): (B, D2, D1) -> (B*D2, D1) -- metadata-only reshape.
    return v2_perm.reshape(B * D2, D1)


def reference_forward(x1):
    v1 = jnp.transpose(x1, (0, 2, 1))
    v2 = jax.nn.softmax(v1, axis=0)
    v3 = v2.reshape(v1.shape[0] * v1.shape[1], v1.shape[2])
    return jnp.clip(v3, 0.0, 6.0)


if __name__ == "__main__":
    key = jax.random.PRNGKey(0)
    k1, k2, k3 = jax.random.split(key, 3)

    # Case 1: D2 splits into >= 2 tiles (exercises the (i, j) <-> (j, i) maps,
    # the fused permute, and the parallel grid axes for v7x megacore).
    B, D1, D2 = 2, 256, 256
    x_a = jax.random.normal(k1, (B, D1, D2), dtype=jnp.float32)
    out_a = jax.block_until_ready(model_forward(x_a))
    ref_a = reference_forward(x_a)
    assert out_a.shape == (B * D2, D1), out_a.shape
    assert jnp.allclose(out_a, ref_a, atol=1e-5, rtol=1e-5), "mismatch (tiled case)"

    # Case 2: single full-array block with a lane-dense output (D1 = 128).
    B2, D1b, D2b = 2, 128, 8
    x_b = jax.random.normal(k2, (B2, D1b, D2b), dtype=jnp.float32)
    out_b = jax.block_until_ready(model_forward(x_b))
    ref_b = reference_forward(x_b)
    assert out_b.shape == (B2 * D2b, D1b), out_b.shape
    assert jnp.allclose(out_b, ref_b, atol=1e-5, rtol=1e-5), "mismatch (full-block case)"

    # Case 3: non-128-multiple D1 with full-D1 blocks and a tiled D2.
    B3, D1c, D2c = 4, 192, 384
    x_c = jax.random.normal(k3, (B3, D1c, D2c), dtype=jnp.float32)
    out_c = jax.block_until_ready(model_forward(x_c))
    ref_c = reference_forward(x_c)
    assert out_c.shape == (B3 * D2c, D1c), out_c.shape
    assert jnp.allclose(out_c, ref_c, atol=1e-5, rtol=1e-5), "mismatch (irregular-D1 case)"

    print("KERNEL_OK")
</pallas_src>

<mosaic_0001>
module attributes {stable_mosaic.version = 11 : i64} {
  func.func @softmax0_permute_kernel(%arg0: i32, %arg1: i32, %arg2: memref<2x256x128xf32, #tpu.memory_space<vmem>>, %arg3: memref<2x128x256xf32, #tpu.memory_space<vmem>>) attributes {dimension_semantics = [#tpu.dimension_semantics<parallel>, #tpu.dimension_semantics<parallel>], iteration_bounds = array<i64: 1, 2>, scalar_prefetch = 0 : i64, scratch_operands = 0 : i64, tpu.core_type = #tpu.core_type<tc>, window_params = [{transform_indices = @transform_0, window_bounds = array<i64: 2, 256, 128>}, {transform_indices = @transform_1, window_bounds = array<i64: 2, 128, 256>}]} {
    %c0 = arith.constant 0 : index
    %c0_0 = arith.constant 0 : index
    %c0_1 = arith.constant 0 : index
    %0 = vector.load %arg2[%c0, %c0_0, %c0_1] : memref<2x256x128xf32, #tpu.memory_space<vmem>>, vector<2x256x128xf32>
    %cst = arith.constant dense<0xFF800000> : vector<256x128xf32>
    %1 = vector.multi_reduction <maximumf>, %0, %cst [0] : vector<2x256x128xf32> to vector<256x128xf32>
    %2 = vector.shape_cast %1 : vector<256x128xf32> to vector<1x256x128xf32>
    %3 = vector.broadcast %2 : vector<1x256x128xf32> to vector<2x256x128xf32>
    %4 = arith.subf %0, %3 : vector<2x256x128xf32>
    %5 = math.exp %4 : vector<2x256x128xf32>
    %cst_2 = arith.constant dense<0.000000e+00> : vector<256x128xf32>
    %6 = vector.multi_reduction <add>, %5, %cst_2 [0] : vector<2x256x128xf32> to vector<256x128xf32>
    %7 = vector.shape_cast %6 : vector<256x128xf32> to vector<1x256x128xf32>
    %cst_3 = arith.constant 1.000000e+00 : f32
    %8 = vector.broadcast %cst_3 : f32 to vector<1x256x128xf32>
    %9 = arith.divf %8, %7 : vector<1x256x128xf32>
    %10 = vector.broadcast %9 : vector<1x256x128xf32> to vector<2x256x128xf32>
    %11 = arith.mulf %5, %10 : vector<2x256x128xf32>
    %12 = tpu.transpose %11, [0, 2, 1] : vector<2x256x128xf32> -> vector<2x128x256xf32>
    %c0_4 = arith.constant 0 : index
    %c0_5 = arith.constant 0 : index
    %c0_6 = arith.constant 0 : index
    %13 = vector.load %arg3[%c0_4, %c0_5, %c0_6] : memref<2x128x256xf32, #tpu.memory_space<vmem>>, vector<2x128x256xf32>
    tpu.vector_store %arg3[%c0_4, %c0_5, %c0_6], %12 {strides = array<i32>} : memref<2x128x256xf32, #tpu.memory_space<vmem>>, vector<2x128x256xf32>,
    return
  }
  func.func @transform_0(%arg0: i32, %arg1: i32) -> (i32, i32, i32) {
    %c0_i32 = arith.constant 0 : i32
    %c0_i32_0 = arith.constant 0 : i32
    return %c0_i32, %arg0, %arg1 : i32, i32, i32
  }
  func.func @transform_1(%arg0: i32, %arg1: i32) -> (i32, i32, i32) {
    %c0_i32 = arith.constant 0 : i32
    %c0_i32_0 = arith.constant 0 : i32
    return %c0_i32, %arg1, %arg0 : i32, i32, i32
  }
}

</mosaic_0001>

<bundles_post_ra>
// kernel: tpu_custom_call.1
= control target key start
LH: loop header
LB: loop body
LE: loop exit
PB: predicated region body
PF: predicated region fallthrough
CT: control target
= control target key end

     0   :  { %6 = vsyncpa [#allocation3], 0  ;;  %s2871_s0 = inlined_call_operand.hbm [shape: f32[2,256,256], index: 0, kind: input, shape index: {}]   ;;  %s2872_s1 = inlined_call_operand.hbm [shape: f32[2,256,256], index: 1, kind: output, shape index: {}]  }
   0x1   :  { %8 = vsyncpa [#allocation3 + $0x1], 0 }
   0x2   :  { %9 = vsyncpa [#allocation4], 0 }
   0x3   :  { %11 = vsyncpa [#allocation4 + $0x1], 0  ;;  %s1733_s6 = smov 0   ;;  %s1735_s7 = smov 0  }
   0x4   :  { %s1737_s8 = smov 0   ;;  %s1739_s9 = smov 0  }
   0x5   :  { %s1741_s10 = smov 0   ;;  %s1743_s11 = smov 0  }
   0x6 LB: > { %s1342_s12 = sadd.s32 4294967295, %s1712_s11   ;;  %s1343_s13 = sadd.s32 4294967294, %s1712_s11   ;;  %s1712_s11 = sphi %s1743_s11, %s17_s11   ;;  %s1708_s10 = sphi %s1741_s10, %s2963_s10   ;;  %s1704_s9 = sphi %s1739_s9, %s2962_s9   ;;  %s1700_s8 = sphi %s1737_s8, %s2961_s8   ;;  %s1696_s7 = sphi %s1735_s7, %s2960_s7   ;;  %s1692_s6 = sphi %s1733_s6, %s2959_s6  }
   0x7   : > { %s26_s14 = sadd.s32 1, %s1708_s10  ;;  %s38_s15 = sadd.s32 1, %s1700_s8 }
   0x8   : > { %p27_p0 = scmp.ge.s32.totalorder %s26_s14, 2  ;;  %p45_p1 = scmp.ne.s32.totalorder %s1700_s8, %s1696_s7 }
   0x9   : > { %p46_p2 = scmp.eq.s32.totalorder %s1712_s11, 0  ;;  %p51_p3 = scmp.ne.s32.totalorder %s1696_s7, %s1692_s6 }
   0xa   : > { %s2965_s14 = smov (%p27_p0, %s26_s14), 0  ;;  %p52_p5 = scmp.eq.s32.totalorder %s1342_s12, 0 }
   0xb   : > { %p1774_p4 = por %p46_p2, %p45_p1  ;;  %s34_s17 = ssub.s32 %s1708_s10, %s2965_s14 }
   0xc   : > { %p77_p6 = scmp.eq.s32.totalorder %s1342_s12, 1  ;;  %p36_p7 = scmp.eq.s32.totalorder %s34_s17, 0 }
   0xd   : > { %p1780_p8 = por %p52_p5, %p51_p3  ;;  %p83_p10 = scmp.eq.s32.totalorder %s1343_s13, 1 }
   0xe   : > { %p1784_p9 = por %p77_p6, %p45_p1  ;;  %p1345_p12 = scmp.ge.s32.totalorder %s1712_s11, 2 }
   0xf   : > { %s1789_s20 = scalar_select %p36_p7, %s1700_s8, %s38_s15  }
  0x10   : > { %p1791_p11 = por %p83_p10, %p51_p3  ;;  %p1377_p13 = scmp.lt.s32.totalorder %s1712_s11, 2 }
  0x11   : > { %s103_s22 = sand.u32 1, %s1700_s8   ;;  %s1347_s24 = sshll.u32 %s1708_s10, 3 }
  0x12   : > { %s1346_s23 = sshll.u32 %s103_s22, 9  ;;  %s114_s27 = scalar_lea.hbm %s2871_s0, %s1347_s24 }
  0x13   : > { %s107_s28 = scalar_lea.vmem [#allocation2], %s1346_s23  ;;  %s115_s30 = sshll.u32 %s114_s27, 4  ;;  %s116_s30 = int_to_ptr.hbm [resolvable:$true] %s115_s30 }
  0x14   : > { %s117_s29 = sshll.u32 %s107_s28, 4  ;;  %p1370_p0 = pnand %p1377_p13, %p1774_p4  ;;  %s118_s29 = int_to_ptr.vmem [resolvable:$true] %s117_s29 }
  0x15   : > { %s104_s2 = scalar_lea.sflag [#allocation3], %s103_s22  ;;  %s1714_s3 = smov 256  }
  0x16   : > { %s1715_s4 = smov 128   ;;  %s1716_s5 = smov 8  }
  0x17   : > { %1372 = dma.hbm_to_vmem [thread:$0]  (!%p1370_p0), %s116_s30, 8192, %s118_s29, %s104_s2, %s1714_s3, %s1715_s4, %s1716_s5  }
  0x18   : > { %p1348_p1 = scmp.ge.s32.totalorder %s1712_s11, 1  ;;  %p125_p2 = scmp.lt.s32.totalorder %s1712_s11, 3 }
  0x1a   : > { %p126_p3 = pnand %p1348_p1, %p125_p2 }
  0x1c   : > { %129 = sbr.rel (%p126_p3) target bundleno = 498 (0x1f2), region = 24 }
  0x21   : > { %s1807_s12 = sand.u32 1, %s1696_s7  }
  0x22   : > { %s1349_s13 = sshll.u32 %s1807_s12, 9  ;;  %s132_s15 = scalar_lea.sflag [#allocation3], %s1807_s12 }
  0x23   : > { %s1813_s16 = scalar_lea.vmem [#allocation2], %s1349_s13 }
  0x24   : > { %1683 = dma.done.wait (%p1780_p8), %s132_s15, 8192  }
  0x25   : > { %1685 = vsyncadd (%p1780_p8), %s132_s15, 4294959104  ;;  %v158_v0 = vld [vmem:[%s1813_s16] sm:$0xff]  ;;  %v159_v2 = vld [vmem:[%s1813_s16 + $0x8] sm:$0xff]  ;;  %s2638_s17 = scalar_lea.vmem [#allocation5], %s1349_s13  ;;  %s1215_s18 = scalar_lea.sflag [#allocation4], %s1807_s12 }
  0x26   : > { %v190_v1 = vld [vmem:[%s1813_s16 + $0x100] sm:$0xff]  ;;  %v191_v4 = vld [vmem:[%s1813_s16 + $0x108] sm:$0xff]  ;;  %v160_v5 = vld [vmem:[%s1813_s16 + $0x10] sm:$0xff] }
  0x27   : > { %v222_v3 = vmax.f32 %v158_v0, %v190_v1  ;;  %v192_v6 = vld [vmem:[%s1813_s16 + $0x110] sm:$0xff]  ;;  %v223_v7 = vmax.f32 %v159_v2, %v191_v4  ;;  %v161_v9 = vld [vmem:[%s1813_s16 + $0x18] sm:$0xff]  ;;  %v162_v14 = vld [vmem:[%s1813_s16 + $0x20] sm:$0xff] }
  0x28   : > { %v224_v8 = vmax.f32 %v160_v5, %v192_v6  ;;  %v193_v10 = vld [vmem:[%s1813_s16 + $0x118] sm:$0xff]  ;;  %v194_v15 = vld [vmem:[%s1813_s16 + $0x120] sm:$0xff]  ;;  %v163_v33 = vld [vmem:[%s1813_s16 + $0x28] sm:$0xff] }
  0x29   : > { %v254_v11 = vsub.f32 %v158_v0, %v222_v3  ;;  %v286_v12 = vsub.f32 %v190_v1, %v222_v3  ;;  %v225_v13 = vmax.f32 %v161_v9, %v193_v10  ;;  %v255_v16 = vsub.f32 %v159_v2, %v223_v7  ;;  %v195_v34 = vld [vmem:[%s1813_s16 + $0x128] sm:$0xff]  ;;  %v164_v51 = vld [vmem:[%s1813_s16 + $0x30] sm:$0xff] }
  0x2a   : > { %v287_v17 = vsub.f32 %v191_v4, %v223_v7  ;;  %v256_v18 = vsub.f32 %v160_v5, %v224_v8  ;;  %v288_v19 = vsub.f32 %v192_v6, %v224_v8  ;;  %v226_v26 = vmax.f32 %v162_v14, %v194_v15  ;;  %v196_v52 = vld [vmem:[%s1813_s16 + $0x130] sm:$0xff]  ;;  %v165_v8 = vld [vmem:[%s1813_s16 + $0x38] sm:$0xff] }
  0x2b   : > { %v318_v20 = vmul.f32 1.442695, %v254_v11  ;;  %v382_v21 = vmul.f32 1.442695, %v286_v12  ;;  %v257_v22 = vsub.f32 %v161_v9, %v225_v13  ;;  %v320_v23 = vmul.f32 1.442695, %v255_v16 }
  0x2c   : > { %v384_v24 = vmul.f32 1.442695, %v287_v17  ;;  %v289_v25 = vsub.f32 %v193_v10, %v225_v13  ;;  %v322_v27 = vmul.f32 1.442695, %v256_v18  ;;  %v386_v28 = vmul.f32 1.442695, %v288_v19 }
  0x2d   : > { %1436 = vpow2.f32 %v318_v20  ;;  %v324_v29 = vmul.f32 1.442695, %v257_v22  ;;  %v258_v31 = vsub.f32 %v162_v14, %v226_v26  ;;  %v290_v32 = vsub.f32 %v194_v15, %v226_v26  ;;  %v197_v9 = vld [vmem:[%s1813_s16 + $0x138] sm:$0xff] }
  0x2e   : > { %1438 = vpow2.f32 %v382_v21  ;;  %v388_v30 = vmul.f32 1.442695, %v289_v25  ;;  %v227_v38 = vmax.f32 %v163_v33, %v195_v34  ;;  %v228_v58 = vmax.f32 %v164_v51, %v196_v52 }
  0x2f   : > { %1440 = vpow2.f32 %v320_v23  ;;  %v326_v37 = vmul.f32 1.442695, %v258_v31  ;;  %v390_v41 = vmul.f32 1.442695, %v290_v32  ;;  %v229_v20 = vmax.f32 %v165_v8, %v197_v9  ;;  %v200_v23 = vld [vmem:[%s1813_s16 + $0x150] sm:$0xff] }
  0x30   : > { %1442 = vpow2.f32 %v384_v24  ;;  %v259_v46 = vsub.f32 %v163_v33, %v227_v38  ;;  %v291_v49 = vsub.f32 %v195_v34, %v227_v38  ;;  %v260_v4 = vsub.f32 %v164_v51, %v228_v58 }
  0x31   : > { %1444 = vpow2.f32 %v322_v27  ;;  %v292_v7 = vsub.f32 %v196_v52, %v228_v58  ;;  %v261_v33 = vsub.f32 %v165_v8, %v229_v20  ;;  %v293_v34 = vsub.f32 %v197_v9, %v229_v20 }
  0x32   : > { %1446 = vpow2.f32 %v386_v28  ;;  %v328_v54 = vmul.f32 1.442695, %v259_v46  ;;  %v392_v57 = vmul.f32 1.442695, %v291_v49  ;;  %v330_v19 = vmul.f32 1.442695, %v260_v4 }
  0x33   : > { %v1831_v35 = vpop.eup %1436  ;;  %1448 = vpow2.f32 %v324_v29  ;;  %v394_v24 = vmul.f32 1.442695, %v292_v7  ;;  %v332_v51 = vmul.f32 1.442695, %v261_v33 }
  0x34   : > { %v1833_v36 = vpop.eup %1438  ;;  %1450 = vpow2.f32 %v388_v30 }
  0x35   : > { %v1835_v39 = vpop.eup %1440  ;;  %v446_v40 = vadd.f32 %v1833_v36, %v1831_v35 }
  0x36   : > { %v1839_v42 = vpop.eup %1442 }
  0x37   : > { %v1841_v43 = vpop.eup %1444  ;;  %1452 = vrcp.f32 %v446_v40  ;;  %v447_v45 = vadd.f32 %v1839_v42, %v1835_v39  ;;  %v489_v56 = vand.u32 2147483648, %v446_v40  ;;  %vm483_vm0 = vweird.f32 %v446_v40 }
  0x38   : > { %v1843_v44 = vpop.eup %1446  ;;  %1454 = vpow2.f32 %v326_v37  ;;  %v487_v0 = vand.u32 2147483647, %v446_v40 }
  0x39   : > { %v1847_v47 = vpop.eup %1448  ;;  %v1851_v48 = vadd.f32 %v1843_v44, %v1841_v43  ;;  %1456 = vpow2.f32 %v390_v41  ;;  %v490_v2 = vor.u32 1.1754944e-38, %v489_v56  ;;  %vm498_vm2 = vweird.f32 %v447_v45  ;;  %v198_v56 = vld [vmem:[%s1813_s16 + $0x140] sm:$0xff] }
  0x3a   : > { %v1853_v50 = vpop.eup %1450  ;;  %1458 = vrcp.f32 %v447_v45  ;;  %v504_v12 = vand.u32 2147483648, %v447_v45  ;;  %vm488_vm5 = vcmp.eq.f32.partialorder %v487_v0, 8.507059e+37  ;;  %v502_v15 = vand.u32 2147483647, %v447_v45 }
  0x3b   : > { %1460 = vrcp.f32 %v1851_v48  ;;  %v1860_v53 = vadd.f32 %v1853_v50, %v1847_v47  ;;  %vm513_vm8 = vweird.f32 %v1851_v48  ;;  %v519_v37 = vand.u32 2147483648, %v1851_v48 }
  0x3c   : > { %v505_v28 = vor.u32 1.1754944e-38, %v504_v12  ;;  %vm503_vm7 = vcmp.eq.f32.partialorder %v502_v15, 8.507059e+37  ;;  %v517_v41 = vand.u32 2147483647, %v1851_v48 }
  0x3d   : > { %v1453_v55 = vpop.eup %1452  ;;  %1462 = vrcp.f32 %v1860_v53  ;;  %v520_v58 = vor.u32 1.1754944e-38, %v519_v37  ;;  %vm528_vm12 = vweird.f32 %v1860_v53  ;;  %v534_v4 = vand.u32 2147483648, %v1860_v53 }
  0x3e   : > { %v1862_v59 = vpop.eup %1454  ;;  %v479_v60 = vmul.f32 %v1453_v55, %v446_v40  ;;  %vm484_vm1 = vweird.f32 %v1453_v55  ;;  %1464 = vpow2.f32 %v328_v54  ;;  %v396_v54 = vmul.f32 1.442695, %v293_v34 }
  0x3f   : > { %v1864_v61 = vpop.eup %1456  ;;  %1466 = vpow2.f32 %v392_v57  ;;  %vm1874_vm3 = vmor %vm483_vm0, %vm484_vm1  ;;  %vm518_vm11 = vcmp.eq.f32.partialorder %v517_v41, 8.507059e+37 }
  0x40   : > { %v1459_v62 = vpop.eup %1458  ;;  %v480_v63 = vsub.f32 1.0, %v479_v60  ;;  %v1880_v13 = vadd.f32 %v1864_v61, %v1862_v59  ;;  %v199_v60 = vld [vmem:[%s1813_s16 + $0x148] sm:$0xff] }
  0x41   : > { %v1867_v1 = vpop.eup %1460  ;;  %v494_v3 = vmul.f32 %v1459_v62, %v447_v45  ;;  %vm499_vm4 = vweird.f32 %v1459_v62 }
  0x42   : > { %v481_v5 = vmul.f32 %v1453_v55, %v480_v63  ;;  %v509_v6 = vmul.f32 %v1867_v1, %v1851_v48  ;;  %vm1889_vm6 = vmor %vm498_vm2, %vm499_vm4  ;;  %1468 = vrcp.f32 %v1880_v13  ;;  %vm514_vm9 = vweird.f32 %v1867_v1  ;;  %v167_v48 = vld [vmem:[%s1813_s16 + $0x48] sm:$0xff] }
  0x43   : > { %v495_v11 = vsub.f32 1.0, %v494_v3  ;;  %v1882_v17 = vpop.eup %1462  ;;  %1470 = vpow2.f32 %v330_v19  ;;  %vm1918_vm10 = vmor %vm513_vm8, %vm514_vm9  ;;  %vm543_vm0 = vweird.f32 %v1880_v13  ;;  %v549_v33 = vand.u32 2147483648, %v1880_v13 }
  0x44   : > { %v482_v14 = vadd.f32 %v1453_v55, %v481_v5  ;;  %v510_v16 = vsub.f32 1.0, %v509_v6  ;;  %v1884_v21 = vpop.eup %1464  ;;  %v524_v31 = vmul.f32 %v1882_v17, %v1860_v53  ;;  %1472 = vpow2.f32 %v394_v24 }
  0x45   : > { %v496_v18 = vmul.f32 %v1459_v62, %v495_v11  ;;  %v1893_v25 = vpop.eup %1466  ;;  %vm529_vm13 = vweird.f32 %v1882_v17  ;;  %v231_v5 = vmax.f32 %v167_v48, %v199_v60 }
  0x46   : > { %v486_v22 = vsel %vm1874_vm3, %v1453_v55, %v482_v14  ;;  %v511_v30 = vmul.f32 %v1867_v1, %v510_v16  ;;  %v1912_v38 = vadd.f32 %v1893_v25, %v1884_v21  ;;  %v525_v45 = vsub.f32 1.0, %v524_v31  ;;  %v166_v55 = vld [vmem:[%s1813_s16 + $0x40] sm:$0xff]  ;;  %vm1954_vm14 = vmor %vm528_vm12, %vm529_vm13 }
  0x47   : > { %v1895_v26 = vsel %vm488_vm5, %v490_v2, %v486_v22  ;;  %v497_v27 = vadd.f32 %v1459_v62, %v496_v18  ;;  %v532_v2 = vand.u32 2147483647, %v1860_v53  ;;  %v230_v3 = vmax.f32 %v166_v55, %v198_v56  ;;  %v168_v53 = vld [vmem:[%s1813_s16 + $0x50] sm:$0xff] }
  0x48   : > { %v958_v29 = vmul.f32 %v1831_v35, %v1895_v26  ;;  %v512_v40 = vadd.f32 %v1867_v1, %v511_v30  ;;  %v1916_v46 = vpop.eup %1468  ;;  %1474 = vrcp.f32 %v1912_v38  ;;  %v526_v0 = vmul.f32 %v1882_v17, %v525_v45 }
  0x49   : > { %v501_v32 = vsel %vm1889_vm6, %v1459_v62, %v497_v27  ;;  %v1926_v57 = vpop.eup %1470  ;;  %1476 = vpow2.f32 %v332_v51  ;;  %v262_v7 = vsub.f32 %v166_v55, %v230_v3  ;;  %v294_v8 = vsub.f32 %v198_v56, %v230_v3 }
  0x4a   : > { %1022 = vxpose.xlu0.b32.start [1/16] %v958_v29, 128  ;;  %v1907_v35 = vsel %vm503_vm7, %v505_v28, %v501_v32  ;;  %v1931_v62 = vpop.eup %1472  ;;  %v516_v63 = vsel %vm1918_vm10, %v1867_v1, %v512_v40  ;;  %1478 = vpow2.f32 %v396_v54  ;;  %v527_v9 = vadd.f32 %v1882_v17, %v526_v0 }
  0x4b   : > { %v959_v52 = vmul.f32 %v1835_v39, %v1907_v35  ;;  %v539_v39 = vmul.f32 %v1916_v46, %v1880_v13  ;;  %v1943_v1 = vsel %vm518_vm11, %v520_v58, %v516_v63  ;;  %v1947_v6 = vadd.f32 %v1931_v62, %v1926_v57  ;;  %v169_v58 = vld [vmem:[%s1813_s16 + $0x58] sm:$0xff] }
  0x4c   : > { %v334_v14 = vmul.f32 1.442695, %v262_v7  ;;  %v960_v15 = vmul.f32 %v1841_v43, %v1943_v1  ;;  %v398_v16 = vmul.f32 1.442695, %v294_v8  ;;  %v263_v18 = vsub.f32 %v167_v48, %v231_v5  ;;  %v201_v48 = vld [vmem:[%s1813_s16 + $0x158] sm:$0xff] }
  0x4d   : > { %v540_v10 = vsub.f32 1.0, %v539_v39  ;;  %vm1962_vm15 = vcmp.eq.f32.partialorder %v532_v2, 8.507059e+37  ;;  %v535_v22 = vor.u32 1.1754944e-38, %v534_v4  ;;  %1480 = vrcp.f32 %v1947_v6 }
  0x4e   : > { %v1950_v11 = vpop.eup %1474  ;;  %v531_v27 = vsel %vm1954_vm14, %v1882_v17, %v527_v9  ;;  %v295_v29 = vsub.f32 %v199_v60, %v231_v5  ;;  %1482 = vpow2.f32 %v334_v14  ;;  %v232_v30 = vmax.f32 %v168_v53, %v200_v23 }
  0x4f   : > { %v1960_v19 = vpop.eup %1476  ;;  %v541_v43 = vmul.f32 %v1916_v46, %v540_v10  ;;  %v554_v28 = vmul.f32 %v1950_v11, %v1912_v38  ;;  %vm544_vm1 = vweird.f32 %v1916_v46  ;;  %1484 = vpow2.f32 %v398_v16 }
  0x50   : > { %v1969_v24 = vpop.eup %1478  ;;  %v336_v31 = vmul.f32 1.442695, %v263_v18  ;;  %v1981_v32 = vsel %vm1962_vm15, %v535_v22, %v531_v27  ;;  %v547_v17 = vand.u32 2147483647, %v1880_v13  ;;  %v400_v41 = vmul.f32 1.442695, %v295_v29  ;;  %vm1992_vm2 = vmor %vm543_vm0, %vm544_vm1 }
  0x51   : > { %v1987_v34 = vadd.f32 %v1969_v24, %v1960_v19  ;;  %v542_v37 = vadd.f32 %v1916_v46, %v541_v43  ;;  %v555_v40 = vsub.f32 1.0, %v554_v28  ;;  %v264_v51 = vsub.f32 %v168_v53, %v232_v30  ;;  %v170_v53 = vld [vmem:[%s1813_s16 + $0x60] sm:$0xff] }
  0x52   : > { %1023 = vxpose.xlu0.b32.cont [2/16] %v959_v52, 128  ;;  %v961_v52 = vmul.f32 %v1847_v47, %v1981_v32  ;;  %1486 = vpow2.f32 %v336_v31  ;;  %v296_v13 = vsub.f32 %v200_v23, %v232_v30  ;;  %vm2000_vm3 = vcmp.eq.f32.partialorder %v547_v17, 8.507059e+37  ;;  %v202_v23 = vld [vmem:[%s1813_s16 + $0x160] sm:$0xff] }
  0x53   : > { %v1990_v45 = vpop.eup %1480  ;;  %v550_v56 = vor.u32 1.1754944e-38, %v549_v33  ;;  %1488 = vrcp.f32 %v1987_v34  ;;  %v546_v63 = vsel %vm1992_vm2, %v1916_v46, %v542_v37  ;;  %v556_v47 = vmul.f32 %v1950_v11, %v555_v40 }
  0x54   : > { %v1998_v54 = vpop.eup %1482  ;;  %v569_v0 = vmul.f32 %v1990_v45, %v1947_v6  ;;  %1490 = vpow2.f32 %v400_v41  ;;  %v338_v39 = vmul.f32 1.442695, %v264_v51  ;;  %vm558_vm4 = vweird.f32 %v1912_v38 }
  0x55   : > { %v2007_v60 = vpop.eup %1484  ;;  %vm559_vm5 = vweird.f32 %v1950_v11  ;;  %v402_v2 = vmul.f32 1.442695, %v296_v13  ;;  %v233_v3 = vmax.f32 %v169_v58, %v201_v48  ;;  %v2019_v4 = vsel %vm2000_vm3, %v550_v56, %v546_v63  ;;  %v171_v63 = vld [vmem:[%s1813_s16 + $0x68] sm:$0xff] }
  0x56   : > { %v562_v46 = vand.u32 2147483647, %v1912_v38  ;;  %v564_v5 = vand.u32 2147483648, %v1912_v38  ;;  %v2025_v7 = vadd.f32 %v2007_v60, %v1998_v54  ;;  %v557_v9 = vadd.f32 %v1950_v11, %v556_v47  ;;  %vm2032_vm6 = vmor %vm558_vm4, %vm559_vm5  ;;  %v203_v47 = vld [vmem:[%s1813_s16 + $0x168] sm:$0xff] }
  0x57   : > { %v570_v10 = vsub.f32 1.0, %v569_v0  ;;  %1492 = vpow2.f32 %v338_v39  ;;  %v962_v38 = vmul.f32 %v1862_v59, %v2019_v4  ;;  %v265_v16 = vsub.f32 %v169_v58, %v233_v3 }
  0x58   : > { %v2027_v8 = vpop.eup %1486  ;;  %1494 = vpow2.f32 %v402_v2  ;;  %vm2040_vm7 = vcmp.eq.f32.partialorder %v562_v46, 8.507059e+37  ;;  %v565_v20 = vor.u32 1.1754944e-38, %v564_v5  ;;  %v297_v22 = vsub.f32 %v201_v48, %v233_v3 }
  0x59   : > { %v2030_v12 = vpop.eup %1488  ;;  %1496 = vrcp.f32 %v2025_v7  ;;  %v561_v27 = vsel %vm2032_vm6, %v1950_v11, %v557_v9  ;;  %v571_v43 = vmul.f32 %v1990_v45, %v570_v10  ;;  %v234_v28 = vmax.f32 %v170_v53, %v202_v23 }
  0x5a   : > { %1024 = vxpose.xlu0.b32.cont [3/16] %v960_v15, 128  ;;  %v2036_v15 = vpop.eup %1490  ;;  %v584_v59 = vmul.f32 %v2030_v12, %v1987_v34  ;;  %vm573_vm8 = vweird.f32 %v1947_v6  ;;  %vm574_vm9 = vweird.f32 %v1990_v45  ;;  %v340_v30 = vmul.f32 1.442695, %v265_v16 }
  0x5b   : > { %v2055_v29 = vadd.f32 %v2036_v15, %v2027_v8  ;;  %v2063_v11 = vsel %vm2040_vm7, %v565_v20, %v561_v27  ;;  %v577_v17 = vand.u32 2147483647, %v1947_v6  ;;  %v579_v33 = vand.u32 2147483648, %v1947_v6  ;;  %vm2072_vm10 = vmor %vm573_vm8, %vm574_vm9 }
  0x5c   : > { %v404_v37 = vmul.f32 1.442695, %v297_v22  ;;  %v572_v41 = vadd.f32 %v1990_v45, %v571_v43  ;;  %v585_v49 = vsub.f32 1.0, %v584_v59  ;;  %v266_v51 = vsub.f32 %v170_v53, %v234_v28  ;;  %v172_v59 = vld [vmem:[%s1813_s16 + $0x70] sm:$0xff] }
  0x5d   : > { %v2059_v31 = vpop.eup %1492  ;;  %1498 = vrcp.f32 %v2055_v29  ;;  %v298_v55 = vsub.f32 %v202_v23, %v234_v28  ;;  %v963_v6 = vmul.f32 %v1884_v21, %v2063_v11  ;;  %vm2079_vm11 = vcmp.eq.f32.partialorder %v577_v17, 8.507059e+37  ;;  %v204_v28 = vld [vmem:[%s1813_s16 + $0x170] sm:$0xff] }
  0x5e   : > { %v2067_v40 = vpop.eup %1494  ;;  %1500 = vpow2.f32 %v340_v30  ;;  %v580_v58 = vor.u32 1.1754944e-38, %v579_v33  ;;  %v576_v0 = vsel %vm2072_vm10, %v1990_v45, %v572_v41  ;;  %v586_v39 = vmul.f32 %v2030_v12, %v585_v49 }
  0x5f   : > { %v2085_v48 = vadd.f32 %v2067_v40, %v2059_v31  ;;  %1502 = vpow2.f32 %v404_v37  ;;  %v342_v2 = vmul.f32 1.442695, %v266_v51  ;;  %v406_v3 = vmul.f32 1.442695, %v298_v55 }
  0x60   : > { %v235_v46 = vmax.f32 %v171_v63, %v203_v47  ;;  %vm588_vm12 = vweird.f32 %v1987_v34  ;;  %vm589_vm13 = vweird.f32 %v2030_v12  ;;  %v2101_v9 = vsel %vm2079_vm11, %v580_v58, %v576_v0 }
  0x61   : > { %v592_v45 = vand.u32 2147483647, %v1987_v34  ;;  %v594_v10 = vand.u32 2147483648, %v1987_v34  ;;  %1504 = vrcp.f32 %v2085_v48  ;;  %vm2111_vm14 = vmor %vm588_vm12, %vm589_vm13  ;;  %v964_v34 = vmul.f32 %v1926_v57, %v2101_v9 }
  0x62   : > { %1025 = vxpose.xlu0.b32.cont [4/16] %v961_v52, 128  ;;  %v2070_v52 = vpop.eup %1496  ;;  %1506 = vpow2.f32 %v342_v2  ;;  %v267_v22 = vsub.f32 %v171_v63, %v235_v46  ;;  %v299_v53 = vsub.f32 %v203_v47, %v235_v46  ;;  %v236_v33 = vmax.f32 %v172_v59, %v204_v28 }
  0x63   : > { %v599_v21 = vmul.f32 %v2070_v52, %v2025_v7  ;;  %v2097_v5 = vpop.eup %1498  ;;  %1508 = vpow2.f32 %v406_v3  ;;  %vm2117_vm15 = vcmp.eq.f32.partialorder %v592_v45, 8.507059e+37  ;;  %v595_v27 = vor.u32 1.1754944e-38, %v594_v10  ;;  %v173_v10 = vld [vmem:[%s1813_s16 + $0x78] sm:$0xff] }
  0x64   : > { %v2106_v14 = vpop.eup %1500  ;;  %v614_v43 = vmul.f32 %v2097_v5, %v2055_v29  ;;  %v344_v41 = vmul.f32 1.442695, %v267_v22  ;;  %vm603_vm0 = vweird.f32 %v2025_v7  ;;  %vm604_vm1 = vweird.f32 %v2070_v52 }
  0x65   : > { %v600_v16 = vsub.f32 1.0, %v599_v21  ;;  %v2109_v18 = vpop.eup %1502  ;;  %v609_v51 = vand.u32 2147483648, %v2025_v7  ;;  %v268_v56 = vsub.f32 %v172_v59, %v236_v33  ;;  %v300_v58 = vsub.f32 %v204_v28, %v236_v33  ;;  %vm2149_vm2 = vmor %vm603_vm0, %vm604_vm1 }
  0x66   : > { %v2131_v57 = vadd.f32 %v2109_v18, %v2106_v14  ;;  %v607_v47 = vand.u32 2147483647, %v2025_v7  ;;  %vm618_vm4 = vweird.f32 %v2055_v29  ;;  %vm619_vm5 = vweird.f32 %v2097_v5 }
  0x67   : > { %v601_v17 = vmul.f32 %v2070_v52, %v600_v16  ;;  %v2133_v37 = vpop.eup %1504  ;;  %v410_v21 = vmul.f32 1.442695, %v300_v58  ;;  %v610_v7 = vor.u32 1.1754944e-38, %v609_v51  ;;  %v624_v22 = vand.u32 2147483648, %v2055_v29  ;;  %vm2181_vm6 = vmor %vm618_vm4, %vm619_vm5  ;;  %v174_v58 = vld [vmem:[%s1813_s16 + $0x80] sm:$0xff] }
  0x68   : > { %v2135_v49 = vpop.eup %1506  ;;  %1510 = vrcp.f32 %v2131_v57  ;;  %v629_v3 = vmul.f32 %v2133_v37, %v2085_v48  ;;  %vm608_vm3 = vcmp.eq.f32.partialorder %v607_v47, 8.507059e+37  ;;  %vm633_vm8 = vweird.f32 %v2085_v48 }
  0x69   : > { %v2140_v13 = vpop.eup %1508  ;;  %v602_v63 = vadd.f32 %v2070_v52, %v601_v17  ;;  %1512 = vpow2.f32 %v344_v41  ;;  %v625_v41 = vor.u32 1.1754944e-38, %v624_v22  ;;  %vm634_vm9 = vweird.f32 %v2133_v37 }
  0x6a   : > { %1026 = vxpose.xlu0.b32.cont [5/16] %v962_v38, 128  ;;  %v587_v38 = vadd.f32 %v2030_v12, %v586_v39  ;;  %v346_v39 = vmul.f32 1.442695, %v268_v56  ;;  %v2159_v46 = vadd.f32 %v2140_v13, %v2135_v49  ;;  %vm2216_vm10 = vmor %vm633_vm8, %vm634_vm9  ;;  %vm648_vm12 = vweird.f32 %v2131_v57 }
  0x6b   : > { %v606_v16 = vsel %vm2149_vm2, %v2070_v52, %v602_v63  ;;  %v206_v63 = vld [vmem:[%s1813_s16 + $0x180] sm:$0xff] }
  0x6c   : > { %v591_v30 = vsel %vm2111_vm14, %v2030_v12, %v587_v38  ;;  %v408_v12 = vmul.f32 1.442695, %v299_v53  ;;  %v205_v38 = vld [vmem:[%s1813_s16 + $0x178] sm:$0xff]  ;;  %v2175_v23 = vsel %vm608_vm3, %v610_v7, %v606_v16  ;;  %v238_v0 = vmax.f32 %v174_v58, %v206_v63 }
  0x6d   : > { %v2144_v55 = vsel %vm2117_vm15, %v595_v27, %v591_v30  ;;  %v622_v27 = vand.u32 2147483647, %v2055_v29  ;;  %v966_v33 = vmul.f32 %v1998_v54, %v2175_v23  ;;  %vm663_vm15 = vweird.f32 %v2159_v46 }
  0x6e   : > { %v965_v2 = vmul.f32 %v1960_v19, %v2144_v55  ;;  %1514 = vpow2.f32 %v408_v12  ;;  %v237_v19 = vmax.f32 %v173_v10, %v205_v38  ;;  %v2169_v20 = vpop.eup %1510  ;;  %v302_v16 = vsub.f32 %v206_v63, %v238_v0 }
  0x6f   : > { %1516 = vpow2.f32 %v346_v39  ;;  %v2173_v53 = vpop.eup %1512  ;;  %v644_v12 = vmul.f32 %v2169_v20, %v2131_v57  ;;  %vm623_vm7 = vcmp.eq.f32.partialorder %v622_v27, 8.507059e+37  ;;  %v637_v39 = vand.u32 2147483647, %v2085_v48 }
  0x70   : > { %1518 = vpow2.f32 %v410_v21  ;;  %v269_v28 = vsub.f32 %v173_v10, %v237_v19  ;;  %v301_v30 = vsub.f32 %v205_v38, %v237_v19  ;;  %v639_v21 = vand.u32 2147483648, %v2085_v48 }
  0x71   : > { %1520 = vrcp.f32 %v2159_v46  ;;  %v645_v7 = vsub.f32 1.0, %v644_v12  ;;  %v270_v48 = vsub.f32 %v174_v58, %v238_v0  ;;  %vm638_vm11 = vcmp.eq.f32.partialorder %v637_v39, 8.507059e+37 }
  0x72   : > { %1027 = vxpose.xlu0.b32.cont [6/16] %v963_v6, 128  ;;  %v615_v6 = vsub.f32 1.0, %v614_v43  ;;  %v348_v47 = vmul.f32 1.442695, %v269_v28  ;;  %v640_v19 = vor.u32 1.1754944e-38, %v639_v21  ;;  %vm649_vm13 = vweird.f32 %v2169_v20 }
  0x73   : > { %v350_v22 = vmul.f32 1.442695, %v270_v48  ;;  %v646_v59 = vmul.f32 %v2169_v20, %v645_v7  ;;  %vm2250_vm14 = vmor %vm648_vm12, %vm649_vm13 }
  0x74   : > { %v616_v45 = vmul.f32 %v2097_v5, %v615_v6  ;;  %v2179_v43 = vpop.eup %1514 }
  0x75   : > { %v2185_v17 = vpop.eup %1516  ;;  %v2199_v56 = vadd.f32 %v2179_v43, %v2173_v53  ;;  %v647_v63 = vadd.f32 %v2169_v20, %v646_v59  ;;  %v176_v59 = vld [vmem:[%s1813_s16 + $0x90] sm:$0xff] }
  0x76   : > { %v617_v52 = vadd.f32 %v2097_v5, %v616_v45  ;;  %v2192_v29 = vpop.eup %1518 }
  0x77   : > { %2909 = vst [vmem:[#allocation10_spill] sm:$0xff] %v2192_v29  ;;  %v2203_v54 = vpop.eup %1520  ;;  %v2214_v45 = vadd.f32 %v2192_v29, %v2185_v17  ;;  %1522 = vrcp.f32 %v2199_v56  ;;  %vm678_vm4 = vweird.f32 %v2199_v56 }
  0x78   : > { %v621_v6 = vsel %vm2181_vm6, %v2097_v5, %v617_v52  ;;  %v412_v5 = vmul.f32 1.442695, %v301_v30  ;;  %v659_v38 = vmul.f32 %v2203_v54, %v2159_v46  ;;  %1524 = vpow2.f32 %v348_v47  ;;  %v175_v30 = vld [vmem:[%s1813_s16 + $0x88] sm:$0xff] }
  0x79   : > { %vm664_vm0 = vweird.f32 %v2203_v54 }
  0x7a   : > { %1028 = vxpose.xlu0.b32.cont [7/16] %v964_v34, 128  ;;  %v630_v34 = vsub.f32 1.0, %v629_v3  ;;  %1526 = vpow2.f32 %v412_v5  ;;  %v660_v28 = vsub.f32 1.0, %v659_v38  ;;  %vm2280_vm2 = vmor %vm663_vm15, %vm664_vm0 }
  0x7b   : > { %1528 = vrcp.f32 %v2214_v45 }
  0x7c   : > { %v631_v51 = vmul.f32 %v2133_v37, %v630_v34  ;;  %v414_v34 = vmul.f32 1.442695, %v302_v16  ;;  %1530 = vpow2.f32 %v350_v22  ;;  %v661_v47 = vmul.f32 %v2203_v54, %v660_v28  ;;  %v208_v28 = vld [vmem:[%s1813_s16 + $0x190] sm:$0xff] }
  0x7d   : > { %v669_v22 = vand.u32 2147483648, %v2159_v46 }
  0x7e   : > { %v632_v3 = vadd.f32 %v2133_v37, %v631_v51  ;;  %1532 = vpow2.f32 %v414_v34  ;;  %v2232_v51 = vpop.eup %1522  ;;  %v651_v34 = vsel %vm2250_vm14, %v2169_v20, %v647_v63 }
  0x7f   : > { %vm679_vm5 = vweird.f32 %v2232_v51 }
  0x80   : > { %v636_v27 = vsel %vm2216_vm10, %v2133_v37, %v632_v3  ;;  %v652_v37 = vand.u32 2147483647, %v2131_v57  ;;  %vm2320_vm6 = vmor %vm678_vm4, %vm679_vm5 }
  0x81   : > { %v2234_v12 = vsel %vm638_vm11, %v640_v19, %v636_v27  ;;  %v667_v19 = vand.u32 2147483647, %v2159_v46 }
  0x82   : > { %1029 = vxpose.xlu0.b32.cont [8/16] %v965_v2, 128  ;;  %v2209_v2 = vsel %vm623_vm7, %v625_v41, %v621_v6  ;;  %v654_v6 = vand.u32 2147483648, %v2131_v57  ;;  %v968_v5 = vmul.f32 %v2059_v31, %v2234_v12  ;;  %v674_v57 = vmul.f32 %v2232_v51, %v2199_v56 }
  0x83   : > { %v967_v52 = vmul.f32 %v2027_v8, %v2209_v2  ;;  %v2238_v8 = vpop.eup %1524  ;;  %vm2262_vm1 = vcmp.eq.f32.partialorder %v652_v37, 8.507059e+37  ;;  %vm668_vm3 = vcmp.eq.f32.partialorder %v667_v19, 8.507059e+37  ;;  %vm693_vm7 = vweird.f32 %v2214_v45 }
  0x84   : > { %v2242_v58 = vpop.eup %1526  ;;  %v655_v16 = vor.u32 1.1754944e-38, %v654_v6  ;;  %v670_v6 = vor.u32 1.1754944e-38, %v669_v22  ;;  %v682_v22 = vand.u32 2147483647, %v2199_v56 }
  0x85   : > { %2912 = vst [vmem:[#allocation11_spill] sm:$0xff] %v2242_v58  ;;  %v2246_v21 = vpop.eup %1528  ;;  %v2288_v37 = vadd.f32 %v2242_v58, %v2238_v8 }
  0x86   : > { %v2256_v7 = vpop.eup %1530  ;;  %v689_v20 = vmul.f32 %v2246_v21, %v2214_v45  ;;  %v2293_v46 = vsel %vm2262_vm1, %v655_v16, %v651_v34  ;;  %vm694_vm8 = vweird.f32 %v2246_v21  ;;  %vm2337_vm11 = vcmp.eq.f32.partialorder %v682_v22, 8.507059e+37 }
  0x87   : > { %v2260_v48 = vpop.eup %1532  ;;  %vm2357_vm13 = vmor %vm693_vm7, %vm694_vm8  ;;  %vm708_vm4 = vweird.f32 %v2288_v37 }
  0x88   : > { %v2274_v27 = vadd.f32 %v2260_v48, %v2256_v7 }
  0x8a   : > { %1030 = vxpose.xlu0.b32.cont [9/16] %v966_v33, 128  ;;  %v207_v33 = vld [vmem:[%s1813_s16 + $0x188] sm:$0xff]  ;;  %vm723_vm9 = vweird.f32 %v2274_v27 }
  0x8b   : > { %v239_v41 = vmax.f32 %v175_v30, %v207_v33 }
  0x8d   : > { %v271_v0 = vsub.f32 %v175_v30, %v239_v41  ;;  %v303_v39 = vsub.f32 %v207_v33, %v239_v41  ;;  %v675_v33 = vsub.f32 1.0, %v674_v57  ;;  %v240_v41 = vmax.f32 %v176_v59, %v208_v28 }
  0x8f   : > { %v352_v10 = vmul.f32 1.442695, %v271_v0  ;;  %v416_v38 = vmul.f32 1.442695, %v303_v39  ;;  %v272_v0 = vsub.f32 %v176_v59, %v240_v41  ;;  %v304_v39 = vsub.f32 %v208_v28, %v240_v41  ;;  %v177_v59 = vld [vmem:[%s1813_s16 + $0x98] sm:$0xff] }
  0x90   : > { %v676_v3 = vmul.f32 %v2232_v51, %v675_v33  ;;  %v209_v28 = vld [vmem:[%s1813_s16 + $0x198] sm:$0xff] }
  0x91   : > { %1534 = vpow2.f32 %v352_v10  ;;  %v354_v10 = vmul.f32 1.442695, %v272_v0  ;;  %v241_v33 = vmax.f32 %v177_v59, %v209_v28  ;;  %v729_v0 = vand.u32 2147483648, %v2274_v27 }
  0x92   : > { %1031 = vxpose.xlu0.b32.cont [10/16] %v967_v52, 128  ;;  %v662_v52 = vadd.f32 %v2203_v54, %v661_v47  ;;  %1536 = vpow2.f32 %v416_v38  ;;  %v684_v47 = vand.u32 2147483648, %v2199_v56  ;;  %v418_v38 = vmul.f32 1.442695, %v304_v39 }
  0x93   : > { %1538 = vrcp.f32 %v2274_v27  ;;  %v677_v30 = vadd.f32 %v2232_v51, %v676_v3  ;;  %v273_v39 = vsub.f32 %v177_v59, %v241_v33  ;;  %v305_v3 = vsub.f32 %v209_v28, %v241_v33 }
  0x94   : > { %v666_v63 = vsel %vm2280_vm2, %v2203_v54, %v662_v52  ;;  %1540 = vrcp.f32 %v2288_v37  ;;  %v969_v54 = vmul.f32 %v2106_v14, %v2293_v46  ;;  %v685_v34 = vor.u32 1.1754944e-38, %v684_v47 }
  0x95   : > { %v2307_v16 = vsel %vm668_vm3, %v670_v6, %v666_v63  ;;  %1542 = vpow2.f32 %v354_v10  ;;  %v727_v47 = vand.u32 2147483647, %v2274_v27  ;;  %v730_v59 = vor.u32 1.1754944e-38, %v729_v0 }
  0x96   : > { %1544 = vpow2.f32 %v418_v38  ;;  %v699_v38 = vand.u32 2147483648, %v2214_v45  ;;  %v356_v28 = vmul.f32 1.442695, %v273_v39  ;;  %v178_v39 = vld [vmem:[%s1813_s16 + $0xa0] sm:$0xff] }
  0x97   : > { %v2300_v57 = vpop.eup %1534  ;;  %vm728_vm14 = vcmp.eq.f32.partialorder %v727_v47, 8.507059e+37 }
  0x98   : > { %v2303_v31 = vpop.eup %1536 }
  0x99   : > { %v1539_v19 = vpop.eup %1538  ;;  %v2314_v52 = vadd.f32 %v2303_v31, %v2300_v57 }
  0x9a   : > { %1032 = vxpose.xlu0.b32.cont [11/16] %v968_v5, 128  ;;  %v690_v5 = vsub.f32 1.0, %v689_v20  ;;  %v719_v14 = vmul.f32 %v1539_v19, %v2274_v27  ;;  %v697_v20 = vand.u32 2147483647, %v2214_v45  ;;  %vm724_vm10 = vweird.f32 %v1539_v19  ;;  %v2330_v63 = vpop.eup %1540 }
  0x9b   : > { %1546 = vrcp.f32 %v2314_v52  ;;  %vm2345_vm12 = vmor %vm723_vm9, %vm724_vm10  ;;  %v704_v41 = vmul.f32 %v2330_v63, %v2288_v37  ;;  %vm738_vm0 = vweird.f32 %v2314_v52  ;;  %vm709_vm5 = vweird.f32 %v2330_v63 }
  0x9c   : > { %v691_v56 = vmul.f32 %v2246_v21, %v690_v5  ;;  %v720_v6 = vsub.f32 1.0, %v719_v14  ;;  %v681_v5 = vsel %vm2320_vm6, %v2232_v51, %v677_v30  ;;  %v2342_v14 = vpop.eup %1542  ;;  %v420_v51 = vmul.f32 1.442695, %v305_v3  ;;  %v210_v3 = vld [vmem:[%s1813_s16 + $0x1a0] sm:$0xff]  ;;  %vm2431_vm6 = vmor %vm708_vm4, %vm709_vm5 }
  0x9d   : > { %v2349_v22 = vpop.eup %1544  ;;  %v970_v30 = vmul.f32 %v2135_v49, %v2307_v16  ;;  %v2365_v0 = vsel %vm2337_vm11, %v685_v34, %v681_v5  ;;  %vm2367_vm15 = vcmp.eq.f32.partialorder %v697_v20, 8.507059e+37  ;;  %1548 = vpow2.f32 %v356_v28  ;;  %v179_v49 = vld [vmem:[%s1813_s16 + $0xa8] sm:$0xff] }
  0x9e   : > { %v692_v58 = vadd.f32 %v2246_v21, %v691_v56  ;;  %v2373_v45 = vadd.f32 %v2349_v22, %v2342_v14  ;;  %1550 = vpow2.f32 %v420_v51  ;;  %v242_v10 = vmax.f32 %v178_v39, %v210_v3 }
  0x9f   : > { %v700_v20 = vor.u32 1.1754944e-38, %v699_v38  ;;  %v705_v28 = vsub.f32 1.0, %v704_v41  ;;  %v744_v51 = vand.u32 2147483648, %v2314_v52 }
  0xa0   : > { %v696_v34 = vsel %vm2357_vm13, %v2246_v21, %v692_v58  ;;  %1552 = vrcp.f32 %v2373_v45  ;;  %v274_v33 = vsub.f32 %v178_v39, %v242_v10  ;;  %v306_v21 = vsub.f32 %v210_v3, %v242_v10 }
  0xa1   : > { %vm753_vm7 = vweird.f32 %v2373_v45 }
  0xa2   : > { %1033 = vxpose.xlu0.b32.cont [12/16] %v969_v54, 128  ;;  %v721_v54 = vmul.f32 %v1539_v19, %v720_v6  ;;  %v1547_v6 = vpop.eup %1546  ;;  %v358_v41 = vmul.f32 1.442695, %v274_v33  ;;  %v422_v3 = vmul.f32 1.442695, %v306_v21 }
  0xa3   : > { %v734_v47 = vmul.f32 %v1547_v6, %v2314_v52  ;;  %vm739_vm1 = vweird.f32 %v1547_v6  ;;  %v2391_v38 = vpop.eup %1548 }
  0xa4   : > { %v722_v56 = vadd.f32 %v1539_v19, %v721_v54  ;;  %vm2399_vm2 = vmor %vm738_vm0, %vm739_vm1  ;;  %1554 = vpow2.f32 %v358_v41 }
  0xa5   : > { %v735_v27 = vsub.f32 1.0, %v734_v47  ;;  %v211_v47 = vld [vmem:[%s1813_s16 + $0x1a8] sm:$0xff]  ;;  %1556 = vpow2.f32 %v422_v3 }
  0xa6   : > { %v726_v54 = vsel %vm2345_vm12, %v1539_v19, %v722_v56  ;;  %v742_v19 = vand.u32 2147483647, %v2314_v52  ;;  %v745_v52 = vor.u32 1.1754944e-38, %v744_v51  ;;  %v706_v56 = vmul.f32 %v2330_v63, %v705_v28 }
  0xa7   : > { %v2383_v5 = vsel %vm728_vm14, %v730_v59, %v726_v54  ;;  %v736_v58 = vmul.f32 %v1547_v6, %v735_v27  ;;  %v971_v59 = vmul.f32 %v2173_v53, %v2365_v0  ;;  %v712_v28 = vand.u32 2147483647, %v2288_v37 }
  0xa8   : > { %v974_v29 = vmul.f32 %v2256_v7, %v2383_v5  ;;  %v2397_v7 = vsel %vm2367_vm15, %v700_v20, %v696_v34  ;;  %vm743_vm3 = vcmp.eq.f32.partialorder %v742_v19, 8.507059e+37  ;;  %v243_v20 = vmax.f32 %v179_v49, %v211_v47 }
  0xa9   : > { %v737_v39 = vadd.f32 %v1547_v6, %v736_v58  ;;  %v714_v27 = vand.u32 2147483648, %v2288_v37  ;;  %v707_v51 = vadd.f32 %v2330_v63, %v706_v56  ;;  %v972_v37 = vmul.f32 %v2185_v17, %v2397_v7 }
  0xaa   : > { %1034 = vxpose.xlu0.b32.cont [13/16] %v970_v30, 128  ;;  %1054 = vxpose.xlu1.b32.start [1/16] %v974_v29, 128  ;;  %v2403_v29 = vpop.eup %1550  ;;  %v759_v30 = vand.u32 2147483648, %v2373_v45  ;;  %vm2442_vm9 = vcmp.eq.f32.partialorder %v712_v28, 8.507059e+37  ;;  %v212_v28 = vld [vmem:[%s1813_s16 + $0x1b0] sm:$0xff] }
  0xab   : > { %v1553_v54 = vpop.eup %1552  ;;  %v2410_v53 = vadd.f32 %v2403_v29, %v2391_v38  ;;  %v741_v10 = vsel %vm2399_vm2, %v1547_v6, %v737_v39  ;;  %v990_v6 = vmul.f32 %v1833_v36, %v1895_v26  ;;  %v275_v36 = vsub.f32 %v179_v49, %v243_v20 }
  0xac   : > { %v749_v34 = vmul.f32 %v1553_v54, %v2373_v45  ;;  %v2419_v19 = vsel %vm743_vm3, %v745_v52, %v741_v10  ;;  %vm754_vm8 = vweird.f32 %v1553_v54  ;;  %v307_v26 = vsub.f32 %v211_v47, %v243_v20  ;;  %v2438_v52 = vpop.eup %1554  ;;  %v180_v20 = vld [vmem:[%s1813_s16 + $0xb0] sm:$0xff] }
  0xad   : > { %1558 = vrcp.f32 %v2410_v53  ;;  %v975_v33 = vmul.f32 %v2300_v57, %v2419_v19  ;;  %1086 = vxpose.xlu2.b32.start [1/16] %v990_v6, 128  ;;  %v715_v56 = vor.u32 1.1754944e-38, %v714_v27  ;;  %vm2446_vm10 = vmor %vm753_vm7, %vm754_vm8  ;;  %v2450_v3 = vpop.eup %1556  ;;  %v711_v49 = vsel %vm2431_vm6, %v2330_v63, %v707_v51 }
  0xae   : > { %v750_v58 = vsub.f32 1.0, %v749_v34  ;;  %v360_v10 = vmul.f32 1.442695, %v275_v36  ;;  %v466_v34 = vadd.f32 %v2450_v3, %v2438_v52  ;;  %v424_v6 = vmul.f32 1.442695, %v307_v26 }
  0xaf   : > { %v2464_v21 = vsel %vm2442_vm9, %v715_v56, %v711_v49  ;;  %vm768_vm12 = vweird.f32 %v2410_v53  ;;  %v213_v49 = vld [vmem:[%s1813_s16 + $0x1b8] sm:$0xff] }
  0xb0   : > { %v751_v57 = vmul.f32 %v1553_v54, %v750_v58  ;;  %v244_v58 = vmax.f32 %v180_v20, %v212_v28  ;;  %1560 = vrcp.f32 %v466_v34  ;;  %vm783_vm0 = vweird.f32 %v466_v34 }
  0xb1   : > { %1562 = vpow2.f32 %v360_v10 }
  0xb2   : > { %1035 = vxpose.xlu0.b32.cont [14/16] %v971_v59, 128  ;;  %v757_v59 = vand.u32 2147483647, %v2373_v45  ;;  %1055 = vxpose.xlu1.b32.cont [2/16] %v975_v33, 128  ;;  %v760_v45 = vor.u32 1.1754944e-38, %v759_v30  ;;  %v752_v47 = vadd.f32 %v1553_v54, %v751_v57  ;;  %v774_v57 = vand.u32 2147483648, %v2410_v53 }
  0xb3   : > { %v1559_v17 = vpop.eup %1558  ;;  %1564 = vpow2.f32 %v424_v6  ;;  %v276_v26 = vsub.f32 %v180_v20, %v244_v58 }
  0xb4   : > { %vm758_vm11 = vcmp.eq.f32.partialorder %v757_v59, 8.507059e+37  ;;  %v756_v27 = vsel %vm2446_vm10, %v1553_v54, %v752_v47  ;;  %v764_v33 = vmul.f32 %v1559_v17, %v2410_v53  ;;  %v991_v59 = vmul.f32 %v1839_v42, %v1907_v35 }
  0xb5   : > { %v2466_v63 = vsel %vm758_vm11, %v760_v45, %v756_v27  ;;  %vm769_vm13 = vweird.f32 %v1559_v17  ;;  %v772_v54 = vand.u32 2147483647, %v2410_v53  ;;  %v973_v42 = vmul.f32 %v2238_v8, %v2464_v21  ;;  %v181_v45 = vld [vmem:[%s1813_s16 + $0xb8] sm:$0xff] }
  0xb6   : > { %v976_v51 = vmul.f32 %v2342_v14, %v2466_v63  ;;  %v765_v30 = vsub.f32 1.0, %v764_v33  ;;  %1087 = vxpose.xlu2.b32.cont [2/16] %v991_v59, 128  ;;  %v308_v14 = vsub.f32 %v212_v28, %v244_v58  ;;  %vm770_vm14 = vmor %vm768_vm12, %vm769_vm13  ;;  %v775_v35 = vor.u32 1.1754944e-38, %v774_v57  ;;  %v1561_v39 = vpop.eup %1560 }
  0xb7   : > { %vm773_vm15 = vcmp.eq.f32.partialorder %v772_v54, 8.507059e+37  ;;  %v362_v41 = vmul.f32 1.442695, %v276_v26  ;;  %v2479_v53 = vpop.eup %1562  ;;  %v779_v10 = vmul.f32 %v1561_v39, %v466_v34  ;;  %v245_v27 = vmax.f32 %v181_v45, %v213_v49 }
  0xb8   : > { %v766_v36 = vmul.f32 %v1559_v17, %v765_v30  ;;  %v426_v56 = vmul.f32 1.442695, %v308_v14  ;;  %v992_v33 = vmul.f32 %v1843_v44, %v1943_v1  ;;  %vm784_vm1 = vweird.f32 %v1561_v39 }
  0xb9   : > { %1566 = vpow2.f32 %v362_v41  ;;  %v2483_v28 = vpop.eup %1564  ;;  %v780_v6 = vsub.f32 1.0, %v779_v10  ;;  %v787_v58 = vand.u32 2147483647, %v466_v34  ;;  %v277_v30 = vsub.f32 %v181_v45, %v245_v27  ;;  %vm2493_vm2 = vmor %vm783_vm0, %vm784_vm1 }
  0xba   : > { %1036 = vxpose.xlu0.b32.cont [15/16] %v972_v37, 128  ;;  %1056 = vxpose.xlu1.b32.cont [3/16] %v976_v51, 128  ;;  %v767_v37 = vadd.f32 %v1559_v17, %v766_v36  ;;  %1568 = vpow2.f32 %v426_v56  ;;  %v467_v59 = vadd.f32 %v2483_v28, %v2479_v53  ;;  %v309_v1 = vsub.f32 %v213_v49, %v245_v27 }
  0xbb   : > { %v781_v51 = vmul.f32 %v1561_v39, %v780_v6  ;;  %vm788_vm3 = vcmp.eq.f32.partialorder %v787_v58, 8.507059e+37  ;;  %v364_v36 = vmul.f32 1.442695, %v277_v30  ;;  %v993_v45 = vmul.f32 %v1853_v50, %v1981_v32 }
  0xbc   : > { %v771_v47 = vsel %vm770_vm14, %v1559_v17, %v767_v37  ;;  %v789_v17 = vand.u32 2147483648, %v466_v34  ;;  %1570 = vrcp.f32 %v467_v59  ;;  %v428_v14 = vmul.f32 1.442695, %v309_v1 }
  0xbd   : > { %v2481_v20 = vsel %vm773_vm15, %v775_v35, %v771_v47  ;;  %v782_v34 = vadd.f32 %v1561_v39, %v781_v51  ;;  %v214_v35 = vld [vmem:[%s1813_s16 + $0x1c0] sm:$0xff]  ;;  %1572 = vpow2.f32 %v364_v36  ;;  %v804_v27 = vand.u32 2147483648, %v467_v59  ;;  %v215_v51 = vld [vmem:[%s1813_s16 + $0x1c8] sm:$0xff] }
  0xbe   : > { %v977_v8 = vmul.f32 %v2391_v38, %v2481_v20  ;;  %1088 = vxpose.xlu2.b32.cont [3/16] %v992_v33, 128  ;;  %v1006_v38 = vmul.f32 %v2260_v48, %v2383_v5  ;;  %v790_v44 = vor.u32 1.1754944e-38, %v789_v17  ;;  %1574 = vpow2.f32 %v428_v14  ;;  %v183_v17 = vld [vmem:[%s1813_s16 + $0xc8] sm:$0xff] }
  0xbf   : > { %v2497_v57 = vpop.eup %1566  ;;  %v786_v48 = vsel %vm2493_vm2, %v1561_v39, %v782_v34  ;;  %v1007_v6 = vmul.f32 %v2303_v31, %v2419_v19  ;;  %vm798_vm4 = vweird.f32 %v467_v59  ;;  %v802_v32 = vand.u32 2147483647, %v467_v59 }
  0xc0   : > { %v2499_v26 = vpop.eup %1568  ;;  %v2507_v41 = vsel %vm788_vm3, %v790_v44, %v786_v48  ;;  %v247_v54 = vmax.f32 %v183_v17, %v215_v51  ;;  %v805_v1 = vor.u32 1.1754944e-38, %v804_v27  ;;  %v994_v34 = vmul.f32 %v1864_v61, %v2019_v4 }
  0xc1   : > { %v468_v5 = vadd.f32 %v2499_v26, %v2497_v57  ;;  %v978_v56 = vmul.f32 %v2438_v52, %v2507_v41  ;;  %vm803_vm7 = vcmp.eq.f32.partialorder %v802_v32, 8.507059e+37 }
  0xc2   : > { %1037 = vxpose.xlu0.b32.end [16/16] %v973_v42, 128  ;;  %1057 = vxpose.xlu1.b32.cont [4/16] %v977_v8, 128  ;;  %v182_v42 = vld [vmem:[%s1813_s16 + $0xc0] sm:$0xff]  ;;  %v1571_v39 = vpop.eup %1570  ;;  %v279_v36 = vsub.f32 %v183_v17, %v247_v54  ;;  %v311_v14 = vsub.f32 %v215_v51, %v247_v54  ;;  %v995_v51 = vmul.f32 %v1893_v25, %v2063_v11 }
  0xc3   : > { %v246_v37 = vmax.f32 %v182_v42, %v214_v35  ;;  %1576 = vrcp.f32 %v468_v5  ;;  %v794_v10 = vmul.f32 %v1571_v39, %v467_v59  ;;  %v2513_v33 = vpop.eup %1572  ;;  %vm799_vm5 = vweird.f32 %v1571_v39 }
  0xc4   : > { %v2517_v58 = vpop.eup %1574  ;;  %vm2526_vm6 = vmor %vm798_vm4, %vm799_vm5  ;;  %v819_v48 = vand.u32 2147483648, %v468_v5  ;;  %vm813_vm8 = vweird.f32 %v468_v5  ;;  %v368_v59 = vmul.f32 1.442695, %v279_v36 }
  0xc5   : > { %v278_v49 = vsub.f32 %v182_v42, %v246_v37  ;;  %v310_v47 = vsub.f32 %v214_v35, %v246_v37  ;;  %v795_v50 = vsub.f32 1.0, %v794_v10  ;;  %v817_v37 = vand.u32 2147483647, %v468_v5 }
  0xc6   : > { %1089 = vxpose.xlu2.b32.cont [4/16] %v993_v45, 128  ;;  %v432_v45 = vmul.f32 1.442695, %v311_v14 }
  0xc7   : > { %v366_v8 = vmul.f32 1.442695, %v278_v49  ;;  %v430_v52 = vmul.f32 1.442695, %v310_v47  ;;  %v796_v44 = vmul.f32 %v1571_v39, %v795_v50  ;;  %v1008_v47 = vmul.f32 %v2349_v22, %v2466_v63  ;;  %v216_v50 = vld [vmem:[%s1813_s16 + $0x1d0] sm:$0xff] }
  0xc8   : > { %vm818_vm11 = vcmp.eq.f32.partialorder %v817_v37, 8.507059e+37 }
  0xc9   : > { %1578 = vpow2.f32 %v366_v8  ;;  %v1577_v30 = vpop.eup %1576  ;;  %v797_v42 = vadd.f32 %v1571_v39, %v796_v44 }
  0xca   : > { %1118 = vxpose.xlu0.b32.start [1/16] %v1006_v38, 128  ;;  %1058 = vxpose.xlu1.b32.cont [5/16] %v978_v56, 128  ;;  %v2523_v38 = vadd.f32 %v2517_v58, %v2513_v33  ;;  %1580 = vpow2.f32 %v430_v52  ;;  %v809_v31 = vmul.f32 %v1577_v30, %v468_v5  ;;  %vm814_vm9 = vweird.f32 %v1577_v30  ;;  %v184_v52 = vld [vmem:[%s1813_s16 + $0xd0] sm:$0xff] }
  0xcb   : > { %v801_v61 = vsel %vm2526_vm6, %v1571_v39, %v797_v42  ;;  %vm2543_vm10 = vmor %vm813_vm8, %vm814_vm9  ;;  %v820_v5 = vor.u32 1.1754944e-38, %v819_v48  ;;  %v248_v63 = vmax.f32 %v184_v52, %v216_v50  ;;  %v1009_v42 = vmul.f32 %v2403_v29, %v2481_v20 }
  0xcc   : > { %1582 = vrcp.f32 %v2523_v38  ;;  %v810_v35 = vsub.f32 1.0, %v809_v31  ;;  %v2541_v10 = vsel %vm803_vm7, %v805_v1, %v801_v61  ;;  %v834_v31 = vand.u32 2147483648, %v2523_v38  ;;  %v217_v61 = vld [vmem:[%s1813_s16 + $0x1d8] sm:$0xff] }
  0xcd   : > { %1584 = vpow2.f32 %v368_v59  ;;  %v979_v8 = vmul.f32 %v2479_v53, %v2541_v10  ;;  %v280_v54 = vsub.f32 %v184_v52, %v248_v63  ;;  %v312_v44 = vsub.f32 %v216_v50, %v248_v63 }
  0xce   : > { %1090 = vxpose.xlu2.b32.cont [5/16] %v994_v34, 128  ;;  %v811_v4 = vmul.f32 %v1577_v30, %v810_v35  ;;  %1586 = vpow2.f32 %v432_v45  ;;  %vm828_vm12 = vweird.f32 %v2523_v38  ;;  %v835_v48 = vor.u32 1.1754944e-38, %v834_v31  ;;  %v186_v31 = vld [vmem:[%s1813_s16 + $0xe0] sm:$0xff] }
  0xcf   : > { %v2533_v56 = vpop.eup %1578  ;;  %v370_v34 = vmul.f32 1.442695, %v280_v54  ;;  %v434_v11 = vmul.f32 1.442695, %v312_v44 }
  0xd0   : > { %v2537_v49 = vpop.eup %1580 }
  0xd1   : > { %v2551_v39 = vadd.f32 %v2537_v49, %v2533_v56 }
  0xd2   : > { %1119 = vxpose.xlu0.b32.cont [2/16] %v1007_v6, 128  ;;  %v812_v6 = vadd.f32 %v1577_v30, %v811_v4  ;;  %v1583_v22 = vpop.eup %1582  ;;  %1059 = vxpose.xlu1.b32.cont [6/16] %v979_v8, 128 }
  0xd3   : > { %v824_v17 = vmul.f32 %v1583_v22, %v2523_v38  ;;  %1588 = vrcp.f32 %v2551_v39  ;;  %v2564_v19 = vpop.eup %1584  ;;  %vm829_vm13 = vweird.f32 %v1583_v22  ;;  %v849_v8 = vand.u32 2147483648, %v2551_v39 }
  0xd4   : > { %v816_v32 = vsel %vm2543_vm10, %v1577_v30, %v812_v6  ;;  %v832_v30 = vand.u32 2147483647, %v2523_v38  ;;  %v2570_v14 = vpop.eup %1586  ;;  %vm2574_vm14 = vmor %vm828_vm12, %vm829_vm13  ;;  %1590 = vpow2.f32 %v370_v34  ;;  %vm843_vm0 = vweird.f32 %v2551_v39 }
  0xd5   : > { %v2559_v53 = vsel %vm818_vm11, %v820_v5, %v816_v32  ;;  %v825_v1 = vsub.f32 1.0, %v824_v17  ;;  %v2580_v59 = vadd.f32 %v2570_v14, %v2564_v19  ;;  %1592 = vpow2.f32 %v434_v11 }
  0xd6   : > { %1091 = vxpose.xlu2.b32.cont [6/16] %v995_v51, 128  ;;  %v980_v36 = vmul.f32 %v2497_v57, %v2559_v53  ;;  %vm833_vm15 = vcmp.eq.f32.partialorder %v832_v30, 8.507059e+37  ;;  %v185_v57 = vld [vmem:[%s1813_s16 + $0xd8] sm:$0xff]  ;;  %v1010_v51 = vmul.f32 %v2450_v3, %v2507_v41  ;;  %v850_v44 = vor.u32 1.1754944e-38, %v849_v8  ;;  %v219_v8 = vld [vmem:[%s1813_s16 + $0x1e8] sm:$0xff] }
  0xd7   : > { %v826_v25 = vmul.f32 %v1583_v22, %v825_v1  ;;  %v249_v45 = vmax.f32 %v185_v57, %v217_v61  ;;  %1594 = vrcp.f32 %v2580_v59  ;;  %v997_v41 = vmul.f32 %v1969_v24, %v2144_v55 }
  0xd8   : > { %v864_v11 = vand.u32 2147483648, %v2580_v59  ;;  %vm858_vm4 = vweird.f32 %v2580_v59 }
  0xd9   : > { %v1589_v37 = vpop.eup %1588  ;;  %v827_v38 = vadd.f32 %v1583_v22, %v826_v25  ;;  %v281_v5 = vsub.f32 %v185_v57, %v249_v45  ;;  %v313_v6 = vsub.f32 %v217_v61, %v249_v45 }
  0xda   : > { %1120 = vxpose.xlu0.b32.cont [3/16] %v1008_v47, 128  ;;  %v839_v4 = vmul.f32 %v1589_v37, %v2551_v39  ;;  %1060 = vxpose.xlu1.b32.cont [7/16] %v980_v36, 128  ;;  %v996_v47 = vmul.f32 %v1931_v62, %v2101_v9  ;;  %v2593_v52 = vpop.eup %1590  ;;  %vm844_vm1 = vweird.f32 %v1589_v37 }
  0xdb   : > { %v831_v29 = vsel %vm2574_vm14, %v1583_v22, %v827_v38  ;;  %v847_v22 = vand.u32 2147483647, %v2551_v39  ;;  %v2597_v63 = vpop.eup %1592  ;;  %vm2601_vm2 = vmor %vm843_vm0, %vm844_vm1  ;;  %v372_v32 = vmul.f32 1.442695, %v281_v5  ;;  %v436_v17 = vmul.f32 1.442695, %v313_v6 }
  0xdc   : > { %v2588_v20 = vsel %vm833_vm15, %v835_v48, %v831_v29  ;;  %v840_v27 = vsub.f32 1.0, %v839_v4  ;;  %v2609_v1 = vadd.f32 %v2597_v63, %v2593_v52  ;;  %v1011_v29 = vmul.f32 %v2483_v28, %v2541_v10  ;;  %v187_v5 = vld [vmem:[%s1813_s16 + $0xe8] sm:$0xff] }
  0xdd   : > { %v981_v62 = vmul.f32 %v2513_v33, %v2588_v20  ;;  %v1595_v39 = vpop.eup %1594  ;;  %vm848_vm3 = vcmp.eq.f32.partialorder %v847_v22, 8.507059e+37  ;;  %1596 = vpow2.f32 %v372_v32  ;;  %v218_v33 = vld [vmem:[%s1813_s16 + $0x1e0] sm:$0xff]  ;;  %v251_v10 = vmax.f32 %v187_v5, %v219_v8 }
  0xde   : > { %1092 = vxpose.xlu2.b32.cont [7/16] %v996_v47, 128  ;;  %v841_v50 = vmul.f32 %v1589_v37, %v840_v27  ;;  %v854_v34 = vmul.f32 %v1595_v39, %v2580_v59  ;;  %1598 = vrcp.f32 %v2609_v1  ;;  %v250_v36 = vmax.f32 %v186_v31, %v218_v33 }
  0xdf   : > { %1600 = vpow2.f32 %v436_v17  ;;  %vm859_vm5 = vweird.f32 %v1595_v39  ;;  %v879_v32 = vand.u32 2147483648, %v2609_v1  ;;  %v283_v17 = vsub.f32 %v187_v5, %v251_v10 }
  0xe0   : > { %v842_v54 = vadd.f32 %v1589_v37, %v841_v50  ;;  %v855_v25 = vsub.f32 1.0, %v854_v34  ;;  %v314_v35 = vsub.f32 %v218_v33, %v250_v36  ;;  %vm2628_vm6 = vmor %vm858_vm4, %vm859_vm5  ;;  %vm873_vm8 = vweird.f32 %v2609_v1 }
  0xe2   : > { %1121 = vxpose.xlu0.b32.cont [4/16] %v1009_v42, 128  ;;  %v846_v30 = vsel %vm2601_vm2, %v1589_v37, %v842_v54  ;;  %1061 = vxpose.xlu1.b32.cont [8/16] %v981_v62, 128  ;;  %v282_v42 = vsub.f32 %v186_v31, %v250_v36  ;;  %v856_v48 = vmul.f32 %v1595_v39, %v855_v25  ;;  %v862_v37 = vand.u32 2147483647, %v2580_v59  ;;  %v188_v25 = vld [vmem:[%s1813_s16 + $0xf0] sm:$0xff] }
  0xe3   : > { %v2617_v3 = vsel %vm848_vm3, %v850_v44, %v846_v30  ;;  %v2624_v38 = vpop.eup %1596  ;;  %v438_v61 = vmul.f32 1.442695, %v314_v35  ;;  %v865_v59 = vor.u32 1.1754944e-38, %v864_v11  ;;  %v998_v62 = vmul.f32 %v2007_v60, %v2175_v23  ;;  %v220_v11 = vld [vmem:[%s1813_s16 + $0x1f0] sm:$0xff] }
  0xe4   : > { %v982_v57 = vmul.f32 %v2533_v56, %v2617_v3  ;;  %v374_v55 = vmul.f32 1.442695, %v282_v42  ;;  %v1599_v4 = vpop.eup %1598  ;;  %v857_v47 = vadd.f32 %v1595_v39, %v856_v48  ;;  %vm863_vm7 = vcmp.eq.f32.partialorder %v862_v37, 8.507059e+37 }
  0xe5   : > { %v2634_v27 = vpop.eup %1600  ;;  %v869_v56 = vmul.f32 %v1599_v4, %v2609_v1  ;;  %vm874_vm9 = vweird.f32 %v1599_v4  ;;  %v877_v54 = vand.u32 2147483647, %v2609_v1  ;;  %v376_v31 = vmul.f32 1.442695, %v283_v17 }
  0xe6   : > { %1093 = vxpose.xlu2.b32.cont [8/16] %v997_v41, 128  ;;  %1602 = vpow2.f32 %v374_v55  ;;  %v861_v6 = vsel %vm2628_vm6, %v1595_v39, %v857_v47  ;;  %v2648_v28 = vadd.f32 %v2634_v27, %v2624_v38  ;;  %vm2662_vm10 = vmor %vm873_vm8, %vm874_vm9  ;;  %v1012_v1 = vmul.f32 %v2499_v26, %v2559_v53 }
  0xe7   : > { %1604 = vpow2.f32 %v438_v61  ;;  %v870_v50 = vsub.f32 1.0, %v869_v56  ;;  %v2650_v22 = vsel %vm863_vm7, %v865_v59, %v861_v6  ;;  %v880_v36 = vor.u32 1.1754944e-38, %v879_v32 }
  0xe8   : > { %1606 = vrcp.f32 %v2648_v28  ;;  %v983_v60 = vmul.f32 %v2564_v19, %v2650_v22  ;;  %vm878_vm11 = vcmp.eq.f32.partialorder %v877_v54, 8.507059e+37  ;;  %v252_v35 = vmax.f32 %v188_v25, %v220_v11 }
  0xe9   : > { %v871_v9 = vmul.f32 %v1599_v4, %v870_v50  ;;  %1608 = vpow2.f32 %v376_v31  ;;  %v999_v53 = vmul.f32 %v2036_v15, %v2209_v2  ;;  %v894_v55 = vand.u32 2147483648, %v2648_v28  ;;  %v221_v50 = vld [vmem:[%s1813_s16 + $0x1f8] sm:$0xff] }
  0xea   : > { %1122 = vxpose.xlu0.b32.cont [5/16] %v1010_v51, 128  ;;  %1062 = vxpose.xlu1.b32.cont [9/16] %v982_v57, 128  ;;  %v315_v51 = vsub.f32 %v219_v8, %v251_v10  ;;  %v284_v37 = vsub.f32 %v188_v25, %v252_v35  ;;  %v316_v57 = vsub.f32 %v220_v11, %v252_v35  ;;  %vm888_vm12 = vweird.f32 %v2648_v28  ;;  %v189_v10 = vld [vmem:[%s1813_s16 + $0xf8] sm:$0xff] }
  0xeb   : > { %v872_v23 = vadd.f32 %v1599_v4, %v871_v9  ;;  %v892_v61 = vand.u32 2147483647, %v2648_v28  ;;  %v1013_v56 = vmul.f32 %v2517_v58, %v2588_v20  ;;  %v895_v8 = vor.u32 1.1754944e-38, %v894_v55 }
  0xec   : > { %v2658_v44 = vpop.eup %1602  ;;  %v440_v33 = vmul.f32 1.442695, %v315_v51  ;;  %v442_v2 = vmul.f32 1.442695, %v316_v57  ;;  %v253_v9 = vmax.f32 %v189_v10, %v221_v50  ;;  %v1000_v32 = vmul.f32 %v2067_v40, %v2234_v12  ;;  %v2957_v12 = vld [vmem:[#allocation10_spill] sm:$0xff] }
  0xed   : > { %v2666_v30 = vpop.eup %1604  ;;  %v876_v41 = vsel %vm2662_vm10, %v1599_v4, %v872_v23  ;;  %v378_v4 = vmul.f32 1.442695, %v284_v37  ;;  %vm893_vm15 = vcmp.eq.f32.partialorder %v892_v61, 8.507059e+37 }
  0xee   : > { %v1038_v45 = vpop.trf.xlu0  ;;  %1094 = vxpose.xlu2.b32.cont [9/16] %v998_v62, 128  ;;  %v2675_v19 = vadd.f32 %v2666_v30, %v2658_v44  ;;  %v1607_v42 = vpop.eup %1606  ;;  %1610 = vpow2.f32 %v440_v33  ;;  %v2681_v26 = vsel %vm878_vm11, %v880_v36, %v876_v41  ;;  %v285_v51 = vsub.f32 %v189_v10, %v253_v9 }
  0xef   : > { %1150 = vst [vmem:[%s2638_s17] sm:$0xff] %v1038_v45  ;;  %v884_v48 = vmul.f32 %v1607_v42, %v2648_v28  ;;  %vm889_vm13 = vweird.f32 %v1607_v42  ;;  %v2688_v45 = vpop.eup %1608  ;;  %v1014_v41 = vmul.f32 %v2537_v49, %v2617_v3  ;;  %v1001_v49 = vmul.f32 %v2109_v18, %v2293_v46 }
  0xf0   : > { %1612 = vrcp.f32 %v2675_v19  ;;  %vm2696_vm14 = vmor %vm888_vm12, %vm889_vm13  ;;  %v909_v54 = vand.u32 2147483648, %v2675_v19  ;;  %vm903_vm0 = vweird.f32 %v2675_v19  ;;  %v907_v31 = vand.u32 2147483647, %v2675_v19 }
  0xf1   : > { %v885_v24 = vsub.f32 1.0, %v884_v48  ;;  %1614 = vpow2.f32 %v378_v4  ;;  %v1015_v18 = vmul.f32 %v2570_v14, %v2650_v22  ;;  %v1002_v14 = vmul.f32 %v2140_v13, %v2307_v16 }
  0xf2   : > { %1123 = vxpose.xlu0.b32.cont [6/16] %v1011_v29, 128  ;;  %1063 = vxpose.xlu1.b32.cont [10/16] %v983_v60, 128  ;;  %v984_v29 = vmul.f32 %v2593_v52, %v2681_v26  ;;  %1616 = vpow2.f32 %v442_v2  ;;  %v317_v60 = vsub.f32 %v221_v50, %v253_v9  ;;  %v910_v11 = vor.u32 1.1754944e-38, %v909_v54 }
  0xf3   : > { %v886_v15 = vmul.f32 %v1607_v42, %v885_v24  ;;  %vm908_vm3 = vcmp.eq.f32.partialorder %v907_v31, 8.507059e+37 }
  0xf4   : > { %v2692_v47 = vpop.eup %1610 }
  0xf5   : > { %v887_v28 = vadd.f32 %v1607_v42, %v886_v15  ;;  %v475_v52 = vadd.f32 %v2692_v47, %v2688_v45 }
  0xf6   : > { %v1039_v34 = vpop.trf.xlu0  ;;  %1095 = vxpose.xlu2.b32.cont [10/16] %v999_v53, 128  ;;  %v1613_v6 = vpop.eup %1612 }
  0xf7   : > { %1152 = vst [vmem:[%s2638_s17 + $0x10] sm:$0xff] %v1039_v34  ;;  %v899_v62 = vmul.f32 %v1613_v6, %v2675_v19  ;;  %v891_v58 = vsel %vm2696_vm14, %v1607_v42, %v887_v28  ;;  %1618 = vrcp.f32 %v475_v52  ;;  %v2713_v23 = vpop.eup %1614  ;;  %vm904_vm1 = vweird.f32 %v1613_v6 }
  0xf8   : > { %v2708_v20 = vsel %vm893_vm15, %v895_v8, %v891_v58  ;;  %v2717_v33 = vpop.eup %1616  ;;  %vm2721_vm2 = vmor %vm903_vm0, %vm904_vm1  ;;  %v380_v34 = vmul.f32 1.442695, %v285_v51  ;;  %v924_v53 = vand.u32 2147483648, %v475_v52  ;;  %vm918_vm4 = vweird.f32 %v475_v52 }
  0xf9   : > { %v900_v17 = vsub.f32 1.0, %v899_v62  ;;  %v985_v40 = vmul.f32 %v2624_v38, %v2708_v20  ;;  %v476_v19 = vadd.f32 %v2717_v33, %v2713_v23  ;;  %v922_v57 = vand.u32 2147483647, %v475_v52 }
  0xfa   : > { %1124 = vxpose.xlu0.b32.cont [7/16] %v1012_v1, 128  ;;  %1064 = vxpose.xlu1.b32.cont [11/16] %v984_v29, 128  ;;  %v444_v1 = vmul.f32 1.442695, %v317_v60  ;;  %1620 = vpow2.f32 %v380_v34  ;;  %v925_v15 = vor.u32 1.1754944e-38, %v924_v53  ;;  %v1016_v62 = vmul.f32 %v2597_v63, %v2681_v26 }
  0xfb   : > { %v901_v39 = vmul.f32 %v1613_v6, %v900_v17  ;;  %1622 = vrcp.f32 %v476_v19  ;;  %vm923_vm7 = vcmp.eq.f32.partialorder %v922_v57, 8.507059e+37  ;;  %vm933_vm8 = vweird.f32 %v476_v19 }
  0xfc   : > { %1624 = vpow2.f32 %v444_v1  ;;  %v937_v28 = vand.u32 2147483647, %v476_v19  ;;  %v1003_v17 = vmul.f32 %v2179_v43, %v2365_v0  ;;  %v1004_v34 = vmul.f32 %v2957_v12, %v2397_v7 }
  0xfd   : > { %v902_v25 = vadd.f32 %v1613_v6, %v901_v39  ;;  %v1619_v42 = vpop.eup %1618  ;;  %v1017_v39 = vmul.f32 %v2634_v27, %v2708_v20  ;;  %v2958_v20 = vld [vmem:[#allocation11_spill] sm:$0xff] }
  0xfe   : > { %v1040_v59 = vpop.trf.xlu0  ;;  %1096 = vxpose.xlu2.b32.cont [11/16] %v1000_v32, 128  ;;  %v914_v35 = vmul.f32 %v1619_v42, %v475_v52  ;;  %vm919_vm5 = vweird.f32 %v1619_v42  ;;  %vm938_vm11 = vcmp.eq.f32.partialorder %v937_v28, 8.507059e+37 }
  0xff   : > { %1154 = vst [vmem:[%s2638_s17 + $0x20] sm:$0xff] %v1040_v59  ;;  %v906_v38 = vsel %vm2721_vm2, %v1613_v6, %v902_v25  ;;  %vm2738_vm6 = vmor %vm918_vm4, %vm919_vm5  ;;  %v939_v6 = vand.u32 2147483648, %v476_v19 }
 0x100   : > { %v2732_v48 = vsel %vm908_vm3, %v910_v11, %v906_v38  ;;  %v915_v3 = vsub.f32 1.0, %v914_v35  ;;  %v1621_v24 = vpop.eup %1620 }
 0x101   : > { %v986_v55 = vmul.f32 %v2658_v44, %v2732_v48  ;;  %v1623_v4 = vpop.eup %1622  ;;  %v940_v9 = vor.u32 1.1754944e-38, %v939_v6  ;;  %v1018_v27 = vmul.f32 %v2666_v30, %v2732_v48 }
 0x102   : > { %1125 = vxpose.xlu0.b32.cont [8/16] %v1013_v56, 128  ;;  %1065 = vxpose.xlu1.b32.cont [12/16] %v985_v40, 128  ;;  %v916_v37 = vmul.f32 %v1619_v42, %v915_v3  ;;  %v2744_v2 = vpop.eup %1624  ;;  %v929_v59 = vmul.f32 %v1623_v4, %v476_v19  ;;  %vm934_vm9 = vweird.f32 %v1623_v4 }
 0x103   : > { %v477_v44 = vadd.f32 %v2744_v2, %v1621_v24  ;;  %vm935_vm10 = vmor %vm933_vm8, %vm934_vm9 }
 0x104   : > { %v917_v46 = vadd.f32 %v1619_v42, %v916_v37  ;;  %v930_v5 = vsub.f32 1.0, %v929_v59 }
 0x105   : > { %1626 = vrcp.f32 %v477_v44  ;;  %v954_v51 = vand.u32 2147483648, %v477_v44  ;;  %vm948_vm12 = vweird.f32 %v477_v44  ;;  %v952_v54 = vand.u32 2147483647, %v477_v44 }
 0x106   : > { %v1041_v36 = vpop.trf.xlu0  ;;  %1097 = vxpose.xlu2.b32.cont [12/16] %v1001_v49, 128  ;;  %v921_v56 = vsel %vm2738_vm6, %v1619_v42, %v917_v46  ;;  %v931_v22 = vmul.f32 %v1623_v4, %v930_v5 }
 0x107   : > { %1156 = vst [vmem:[%s2638_s17 + $0x30] sm:$0xff] %v1041_v36  ;;  %v926_v8 = vsel %vm923_vm7, %v925_v15, %v921_v56  ;;  %v955_v31 = vor.u32 1.1754944e-38, %v954_v51  ;;  %vm953_vm15 = vcmp.eq.f32.partialorder %v952_v54, 8.507059e+37  ;;  %v1005_v36 = vmul.f32 %v2958_v20, %v2464_v21 }
 0x108   : > { %v987_v52 = vmul.f32 %v2688_v45, %v926_v8  ;;  %v932_v10 = vadd.f32 %v1623_v4, %v931_v22  ;;  %v1019_v7 = vmul.f32 %v2692_v47, %v926_v8 }
 0x10a   : > { %1126 = vxpose.xlu0.b32.cont [9/16] %v1014_v41, 128  ;;  %1066 = vxpose.xlu1.b32.cont [13/16] %v986_v55, 128  ;;  %v936_v58 = vsel %vm935_vm10, %v1623_v4, %v932_v10 }
 0x10b   : > { %v1627_v13 = vpop.eup %1626  ;;  %v941_v32 = vsel %vm938_vm11, %v940_v9, %v936_v58 }
 0x10c   : > { %v944_v16 = vmul.f32 %v1627_v13, %v477_v44  ;;  %vm949_vm13 = vweird.f32 %v1627_v13  ;;  %v988_v63 = vmul.f32 %v2713_v23, %v941_v32  ;;  %v1020_v11 = vmul.f32 %v2717_v33, %v941_v32 }
 0x10d   : > { %vm950_vm14 = vmor %vm948_vm12, %vm949_vm13 }
 0x10e   : > { %v1042_v29 = vpop.trf.xlu0  ;;  %1098 = vxpose.xlu2.b32.cont [13/16] %v1002_v14, 128  ;;  %v945_v45 = vsub.f32 1.0, %v944_v16 }
 0x10f   : > { %1158 = vst [vmem:[%s2638_s17 + $0x40] sm:$0xff] %v1042_v29 }
 0x110   : > { %v946_v26 = vmul.f32 %v1627_v13, %v945_v45 }
 0x112   : > { %1127 = vxpose.xlu0.b32.cont [10/16] %v1015_v18, 128  ;;  %1067 = vxpose.xlu1.b32.cont [14/16] %v987_v52, 128  ;;  %v947_v40 = vadd.f32 %v1627_v13, %v946_v26 }
 0x114   : > { %v951_v43 = vsel %vm950_vm14, %v1627_v13, %v947_v40 }
 0x115   : > { %v956_v0 = vsel %vm953_vm15, %v955_v31, %v951_v43 }
 0x116   : > { %v1043_v50 = vpop.trf.xlu0  ;;  %1099 = vxpose.xlu2.b32.cont [14/16] %v1003_v17, 128  ;;  %v989_v23 = vmul.f32 %v1621_v24, %v956_v0  ;;  %v1021_v30 = vmul.f32 %v2744_v2, %v956_v0 }
 0x117   : > { %1160 = vst [vmem:[%s2638_s17 + $0x50] sm:$0xff] %v1043_v50 }
 0x11a   : > { %1128 = vxpose.xlu0.b32.cont [11/16] %v1016_v62, 128  ;;  %1068 = vxpose.xlu1.b32.cont [15/16] %v988_v63, 128 }
 0x11e   : > { %v1044_v60 = vpop.trf.xlu0  ;;  %1100 = vxpose.xlu2.b32.cont [15/16] %v1004_v34, 128 }
 0x11f   : > { %1162 = vst [vmem:[%s2638_s17 + $0x60] sm:$0xff] %v1044_v60 }
 0x122   : > { %1129 = vxpose.xlu0.b32.cont [12/16] %v1017_v39, 128  ;;  %1069 = vxpose.xlu1.b32.end [16/16] %v989_v23, 128 }
 0x126   : > { %v1045_v1 = vpop.trf.xlu0  ;;  %1101 = vxpose.xlu2.b32.end [16/16] %v1005_v36, 128 }
 0x127   : > { %1164 = vst [vmem:[%s2638_s17 + $0x70] sm:$0xff] %v1045_v1 }
 0x12a   : > { %1130 = vxpose.xlu0.b32.cont [13/16] %v1018_v27, 128 }
 0x12e   : > { %v1046_v41 = vpop.trf.xlu0 }
 0x12f   : > { %1166 = vst [vmem:[%s2638_s17 + $0x80] sm:$0xff] %v1046_v41 }
 0x132   : > { %1131 = vxpose.xlu0.b32.cont [14/16] %v1019_v7, 128 }
 0x136   : > { %v1047_v25 = vpop.trf.xlu0 }
 0x137   : > { %1168 = vst [vmem:[%s2638_s17 + $0x90] sm:$0xff] %v1047_v25 }
 0x13a   : > { %1132 = vxpose.xlu0.b32.cont [15/16] %v1020_v11, 128 }
 0x13e   : > { %v1048_v21 = vpop.trf.xlu0 }
 0x13f   : > { %1170 = vst [vmem:[%s2638_s17 + $0xa0] sm:$0xff] %v1048_v21 }
 0x142   : > { %1133 = vxpose.xlu0.b32.end [16/16] %v1021_v30, 128 }
 0x146   : > { %v1049_v19 = vpop.trf.xlu0 }
 0x147   : > { %1172 = vst [vmem:[%s2638_s17 + $0xb0] sm:$0xff] %v1049_v19  ;;  %v1102_v47 = vpop.trf.xlu2 }
 0x148   : > { %1182 = vst [vmem:[%s2638_s17 + $0x100] sm:$0xff] %v1102_v47 }
 0x14e   : > { %v1050_v42 = vpop.trf.xlu0  ;;  %v1070_v33 = vpop.trf.xlu1 }
 0x14f   : > { %1174 = vst [vmem:[%s2638_s17 + $0xc0] sm:$0xff] %v1050_v42  ;;  %v1103_v38 = vpop.trf.xlu2 }
 0x150   : > { %1151 = vst [vmem:[%s2638_s17 + $0x8] sm:$0xff] %v1070_v33 }
 0x151   : > { %1184 = vst [vmem:[%s2638_s17 + $0x110] sm:$0xff] %v1103_v38 }
 0x156   : > { %v1051_v35 = vpop.trf.xlu0  ;;  %v1071_v48 = vpop.trf.xlu1 }
 0x157   : > { %1176 = vst [vmem:[%s2638_s17 + $0xd0] sm:$0xff] %v1051_v35  ;;  %v1104_v49 = vpop.trf.xlu2 }
 0x158   : > { %1153 = vst [vmem:[%s2638_s17 + $0x18] sm:$0xff] %v1071_v48 }
 0x159   : > { %1186 = vst [vmem:[%s2638_s17 + $0x120] sm:$0xff] %v1104_v49 }
 0x15e   : > { %v1052_v3 = vpop.trf.xlu0  ;;  %v1072_v53 = vpop.trf.xlu1 }
 0x15f   : > { %1178 = vst [vmem:[%s2638_s17 + $0xe0] sm:$0xff] %v1052_v3  ;;  %v1105_v37 = vpop.trf.xlu2 }
 0x160   : > { %1155 = vst [vmem:[%s2638_s17 + $0x28] sm:$0xff] %v1072_v53 }
 0x161   : > { %1188 = vst [vmem:[%s2638_s17 + $0x130] sm:$0xff] %v1105_v37 }
 0x166   : > { %v1053_v57 = vpop.trf.xlu0  ;;  %v1073_v24 = vpop.trf.xlu1 }
 0x167   : > { %1180 = vst [vmem:[%s2638_s17 + $0xf0] sm:$0xff] %v1053_v57  ;;  %v1106_v55 = vpop.trf.xlu2 }
 0x168   : > { %1157 = vst [vmem:[%s2638_s17 + $0x38] sm:$0xff] %v1073_v24 }
 0x169   : > { %1190 = vst [vmem:[%s2638_s17 + $0x140] sm:$0xff] %v1106_v55 }
 0x16e   : > { %v1134_v61 = vpop.trf.xlu0  ;;  %v1074_v4 = vpop.trf.xlu1 }
 0x16f   : > { %1183 = vst [vmem:[%s2638_s17 + $0x108] sm:$0xff] %v1134_v61  ;;  %v1107_v29 = vpop.trf.xlu2 }
 0x170   : > { %1159 = vst [vmem:[%s2638_s17 + $0x48] sm:$0xff] %v1074_v4 }
 0x171   : > { %1192 = vst [vmem:[%s2638_s17 + $0x150] sm:$0xff] %v1107_v29 }
 0x176   : > { %v1135_v18 = vpop.trf.xlu0  ;;  %v1075_v46 = vpop.trf.xlu1 }
 0x177   : > { %1185 = vst [vmem:[%s2638_s17 + $0x118] sm:$0xff] %v1135_v18  ;;  %v1108_v15 = vpop.trf.xlu2 }
 0x178   : > { %1161 = vst [vmem:[%s2638_s17 + $0x58] sm:$0xff] %v1075_v46 }
 0x179   : > { %1194 = vst [vmem:[%s2638_s17 + $0x160] sm:$0xff] %v1108_v15 }
 0x17e   : > { %v1136_v2 = vpop.trf.xlu0  ;;  %v1076_v59 = vpop.trf.xlu1 }
 0x17f   : > { %1187 = vst [vmem:[%s2638_s17 + $0x128] sm:$0xff] %v1136_v2  ;;  %v1109_v56 = vpop.trf.xlu2 }
 0x180   : > { %1163 = vst [vmem:[%s2638_s17 + $0x68] sm:$0xff] %v1076_v59 }
 0x181   : > { %1196 = vst [vmem:[%s2638_s17 + $0x170] sm:$0xff] %v1109_v56 }
 0x186   : > { %v1137_v44 = vpop.trf.xlu0  ;;  %v1077_v5 = vpop.trf.xlu1 }
 0x187   : > { %1189 = vst [vmem:[%s2638_s17 + $0x138] sm:$0xff] %v1137_v44  ;;  %v1110_v8 = vpop.trf.xlu2 }
 0x188   : > { %1165 = vst [vmem:[%s2638_s17 + $0x78] sm:$0xff] %v1077_v5 }
 0x189   : > { %1198 = vst [vmem:[%s2638_s17 + $0x180] sm:$0xff] %v1110_v8 }
 0x18e   : > { %v1138_v14 = vpop.trf.xlu0  ;;  %v1078_v22 = vpop.trf.xlu1 }
 0x18f   : > { %1191 = vst [vmem:[%s2638_s17 + $0x148] sm:$0xff] %v1138_v14  ;;  %v1111_v6 = vpop.trf.xlu2 }
 0x190   : > { %1167 = vst [vmem:[%s2638_s17 + $0x88] sm:$0xff] %v1078_v22 }
 0x191   : > { %1200 = vst [vmem:[%s2638_s17 + $0x190] sm:$0xff] %v1111_v6 }
 0x196   : > { %v1139_v28 = vpop.trf.xlu0  ;;  %v1079_v52 = vpop.trf.xlu1 }
 0x197   : > { %1193 = vst [vmem:[%s2638_s17 + $0x158] sm:$0xff] %v1139_v28  ;;  %v1112_v10 = vpop.trf.xlu2 }
 0x198   : > { %1169 = vst [vmem:[%s2638_s17 + $0x98] sm:$0xff] %v1079_v52 }
 0x199   : > { %1202 = vst [vmem:[%s2638_s17 + $0x1a0] sm:$0xff] %v1112_v10 }
 0x19e   : > { %v1140_v50 = vpop.trf.xlu0  ;;  %v1080_v62 = vpop.trf.xlu1 }
 0x19f   : > { %1195 = vst [vmem:[%s2638_s17 + $0x168] sm:$0xff] %v1140_v50  ;;  %v1113_v9 = vpop.trf.xlu2 }
 0x1a0   : > { %1171 = vst [vmem:[%s2638_s17 + $0xa8] sm:$0xff] %v1080_v62 }
 0x1a1   : > { %1204 = vst [vmem:[%s2638_s17 + $0x1b0] sm:$0xff] %v1113_v9 }
 0x1a6   : > { %v1141_v58 = vpop.trf.xlu0  ;;  %v1081_v13 = vpop.trf.xlu1 }
 0x1a7   : > { %1197 = vst [vmem:[%s2638_s17 + $0x178] sm:$0xff] %v1141_v58  ;;  %v1114_v16 = vpop.trf.xlu2 }
 0x1a8   : > { %1173 = vst [vmem:[%s2638_s17 + $0xb8] sm:$0xff] %v1081_v13 }
 0x1a9   : > { %1206 = vst [vmem:[%s2638_s17 + $0x1c0] sm:$0xff] %v1114_v16 }
 0x1ae   : > { %v1142_v32 = vpop.trf.xlu0  ;;  %v1082_v17 = vpop.trf.xlu1 }
 0x1af   : > { %1199 = vst [vmem:[%s2638_s17 + $0x188] sm:$0xff] %v1142_v32  ;;  %v1115_v45 = vpop.trf.xlu2 }
 0x1b0   : > { %1175 = vst [vmem:[%s2638_s17 + $0xc8] sm:$0xff] %v1082_v17 }
 0x1b1   : > { %1208 = vst [vmem:[%s2638_s17 + $0x1d0] sm:$0xff] %v1115_v45 }
 0x1b6   : > { %v1143_v51 = vpop.trf.xlu0  ;;  %v1083_v54 = vpop.trf.xlu1 }
 0x1b7   : > { %1201 = vst [vmem:[%s2638_s17 + $0x198] sm:$0xff] %v1143_v51  ;;  %v1116_v63 = vpop.trf.xlu2 }
 0x1b8   : > { %1177 = vst [vmem:[%s2638_s17 + $0xd8] sm:$0xff] %v1083_v54 }
 0x1b9   : > { %1210 = vst [vmem:[%s2638_s17 + $0x1e0] sm:$0xff] %v1116_v63 }
 0x1be   : > { %v1144_v26 = vpop.trf.xlu0  ;;  %v1084_v60 = vpop.trf.xlu1 }
 0x1bf   : > { %1203 = vst [vmem:[%s2638_s17 + $0x1a8] sm:$0xff] %v1144_v26  ;;  %v1117_v39 = vpop.trf.xlu2 }
 0x1c0   : > { %1179 = vst [vmem:[%s2638_s17 + $0xe8] sm:$0xff] %v1084_v60 }
 0x1c1   : > { %1212 = vst [vmem:[%s2638_s17 + $0x1f0] sm:$0xff] %v1117_v39 }
 0x1c6   : > { %v1145_v31 = vpop.trf.xlu0  ;;  %v1085_v40 = vpop.trf.xlu1 }
 0x1c7   : > { %1205 = vst [vmem:[%s2638_s17 + $0x1b8] sm:$0xff] %v1145_v31 }
 0x1c8   : > { %1181 = vst [vmem:[%s2638_s17 + $0xf8] sm:$0xff] %v1085_v40 }
 0x1ce   : > { %v1146_v43 = vpop.trf.xlu0 }
 0x1cf   : > { %1207 = vst [vmem:[%s2638_s17 + $0x1c8] sm:$0xff] %v1146_v43 }
 0x1d6   : > { %v1147_v0 = vpop.trf.xlu0 }
 0x1d7   : > { %1209 = vst [vmem:[%s2638_s17 + $0x1d8] sm:$0xff] %v1147_v0 }
 0x1de   : > { %v1148_v12 = vpop.trf.xlu0 }
 0x1df   : > { %1211 = vst [vmem:[%s2638_s17 + $0x1e8] sm:$0xff] %v1148_v12 }
 0x1e6   : > { %v1149_v34 = vpop.trf.xlu0 }
 0x1e7   : > { %1213 = vst [vmem:[%s2638_s17 + $0x1f8] sm:$0xff] %v1149_v34 }
 0x1e8   : > { %s1358_s22 = sshll.u32 %s1704_s9, 8  ;;  %s1240_s23 = sshll.u32 %s2638_s17, 4  ;;  %s1241_s23 = int_to_ptr.vmem [resolvable:$true] %s1240_s23 }
 0x1e9   : > { %s1229_s26 = scalar_lea.hbm %s2872_s1, %s1358_s22  ;;  %s1717_s28 = smov 4096  }
 0x1ea   : > { %s1242_s27 = sshll.u32 %s1229_s26, 4  ;;  %1361 = sst [smem:[#allocation7]] (%p1784_p9), %s1717_s28  ;;  %s1243_s27 = int_to_ptr.hbm [resolvable:$true] %s1242_s27 }
 0x1eb   : > { %s1718_s29 = smov 8192   ;;  %s1719_s30 = smov 16  }
 0x1ec   : > { %1362 = sst [smem:[#allocation7 + $0x1]] (%p1784_p9), %s1718_s29  ;;  %s1720_s2 = smov 256  }
 0x1ed   : > { %1363 = sst [smem:[#allocation7 + $0x2]] (%p1784_p9), %s1719_s30  ;;  %s1721_s9 = smov [#allocation6]  }
 0x1ee   : > { %1364 = sst [smem:[#allocation7 + $0x3]] (%p1784_p9), %s1720_s2  ;;  %s1722_s3 = smov 0  }
 0x1ef   : > { %1365 = sst [smem:[#allocation7 + $0x4]] (%p1784_p9), %s1720_s2 }
 0x1f0   : > { %1366 = sst [smem:[#allocation7 + $0x5]] (%p1784_p9), %s1719_s30 }
 0x1f1   : > { %1367 = dma.general (%p1784_p9), %s1241_s23, 8192, %s1243_s27, %s1215_s18, %s1721_s9, [#allocation7], %s1722_s3, 0  }
 0x1f2 PF: > { %s1270_s4 = sand.u32 1, %s1692_s6   ;;  %p1374_p4 = pnand %p1345_p12, %p1791_p11 }
 0x1f3   : > { %s1271_s5 = scalar_lea.sflag [#allocation4], %s1270_s4 }
 0x1f4   : > { %p1375_p5 = pneg %p1374_p4 }
 0x1f6   : > { %1687 = dma.done.wait (%p1375_p5), %s1271_s5, 8192  }
 0x1f7   : > { %1689 = vsyncadd (%p1375_p5), %s1271_s5, 4294959104  ;;  %s17_s11 = sadd.s32 1, %s1712_s11   ;;  %s2959_s6 = smov %s1696_s7 }
 0x1f8   : > { %p14_p6 = scmp.ge.s32.totalorder %s17_s11, 4   ;;  %s2960_s7 = smov %s1700_s8 }
 0x1f9   : > { %s2961_s8 = smov %s1789_s20  ;;  %s2962_s9 = smov %s1708_s10 }
 0x1fa   : > { %s2963_s10 = smov %s2965_s14  ;;  %16 = sbr.rel (!%p14_p6) target bundleno = 6 (0x6), region = 74 }
 0x1ff   :  { %1277 = vsyncpa [#allocation3], 1 }
 0x200   :  { %1279 = vsyncpa [#allocation3 + $0x1], 1 }
 0x201   :  { %1280 = vsyncpa [#allocation4], 1 }
 0x202   :  { %1282 = vsyncpa [#allocation4 + $0x1], 1 }

</bundles_post_ra>
